<compile_context>
chip_gen: v7x
topology: tpu7x:2x2x1
jax: 0.10.0
libtpu: 0.0.40
codegen_flags: <defaults>
</compile_context>

<pallas_src>
import functools

import numpy as np

import jax
import jax.numpy as jnp
from jax.experimental import pallas as pl
from jax.experimental.pallas import tpu as pltpu


# ----------------------------------------------------------------------------
# Model configuration (synthetic, deterministic)
# ----------------------------------------------------------------------------
IMG_SIZE = 32
C_IN = 3
C_FEAT = 16        # backbone (C4) channels
C_MID = 8          # bottleneck mid channels
C_LAYER4 = 32      # layer4 output channels == attnpool embed_dim
ROI_RES = 8        # ROIAlign output resolution (layer4 halves it to 4)
NUM_HEADS = 4
OUT_DIM = 24       # attnpool output_dim
OUT_PAD = 128      # lane-dense padded output width (sliced back to OUT_DIM)
STEM_STRIDE = 2


# ----------------------------------------------------------------------------
# Pallas kernels
# ----------------------------------------------------------------------------
def _stem_matmul_kernel(x_ref, w_ref, b_ref, o_ref):
    """relu(x @ w + b); bf16 MXU inputs, f32 accumulate/epilogue."""
    y = jnp.dot(x_ref[...], w_ref[...], preferred_element_type=jnp.float32)
    y = y + b_ref[...]
    o_ref[...] = jnp.maximum(y, 0.0).astype(o_ref.dtype)


def stem_conv_matmul(cols, w, b):
    """Stem conv as im2col-matmul. cols:[M,K] w:[K,N] b:[N] -> [M,N] f32."""
    M, _ = cols.shape
    N = w.shape[1]
    return pl.pallas_call(
        _stem_matmul_kernel,
        out_shape=jax.ShapeDtypeStruct((M, N), jnp.float32),
    )(cols.astype(jnp.bfloat16), w.astype(jnp.bfloat16),
      b.reshape(1, N).astype(jnp.float32))


def _region_head_kernel(bf_ref, selc_ref, selds_ref,
                        w1_ref, b1_ref, w2_ref, b2_ref, w3_ref, b3_ref,
                        wd_ref, bd_ref, pos0_ref, poss_ref,
                        wqkv_ref, bqkv_ref, hm_ref, hmt_ref, wo_ref, bo_ref,
                        o_ref, *, num_heads):
    """Fused layer4 bottleneck + CLIP AttentionPool2d for one ROI.

    bf_ref  : (1, S*S, C_FEAT) bf16 ROIAlign features (flattened spatial)
    selc_ref: (9*P*P, S*S)     bf16 static 3x3/s2 tap-selection matrices (stacked)
    selds_ref:(P*P, S*S)       bf16 static stride-2 shortcut selection matrix
    o_ref   : (1, 1, OUT_PAD)  f32 lane-dense output slab
    """
    f32 = jnp.float32
    bf16 = jnp.bfloat16

    bf = bf_ref[0]                                             # (S*S, C_FEAT)

    # ---------------- layer4 bottleneck (all in VMEM / vregs) ----------------
    # 1x1 conv
    y1 = jnp.dot(bf, w1_ref[...], preferred_element_type=f32) + b1_ref[...]
    y1 = jnp.maximum(y1, 0.0).astype(bf16)                     # (S*S, C_MID)

    # 3x3 stride-2 conv via static tap-selection matmuls (exact 0/1 gathers)
    n_taps = w2_ref.shape[0]
    npix = selds_ref.shape[0]                                  # P*P output positions
    g_all = jnp.dot(selc_ref[...], y1, preferred_element_type=f32)  # (9*P*P, C_MID)
    y2 = jnp.zeros((npix, w2_ref.shape[2]), f32)
    for t in range(n_taps):                                    # static unroll
        g = g_all[t * npix:(t + 1) * npix, :].astype(bf16)
        y2 = y2 + jnp.dot(g, w2_ref[t], preferred_element_type=f32)
    y2 = jnp.maximum(y2 + b2_ref[...], 0.0).astype(bf16)       # (P*P, C_MID)

    # stride-2 shortcut: spatial subsample (selection matmul) + 1x1 conv
    ds = jnp.dot(selds_ref[...], bf, preferred_element_type=f32).astype(bf16)
    sc = jnp.dot(ds, wd_ref[...], preferred_element_type=f32) + bd_ref[...]

    # final 1x1 conv + residual + relu
    y3 = jnp.dot(y2, w3_ref[...], preferred_element_type=f32) + b3_ref[...] + sc
    y3 = jnp.maximum(y3, 0.0)                                  # (P*P, C) f32 tokens

    # ---------------- CLIP AttentionPool2d (heads batched) -------------------
    C = wqkv_ref.shape[0]
    dh = C // num_heads
    scale = 1.0 / (dh ** 0.5)

    mean = jnp.mean(y3, axis=0, keepdims=True)                 # CLS token, (1, C)
    xc = mean + pos0_ref[...]                                  # (1, C)
    xs = y3 + poss_ref[...]                                    # (HW, C)

    qkv_c = jnp.dot(xc.astype(bf16), wqkv_ref[...],
                    preferred_element_type=f32) + bqkv_ref[...]          # (1, 3C)
    qkv_s = jnp.dot(xs.astype(bf16), wqkv_ref[...],
                    preferred_element_type=f32) + bqkv_ref[...]          # (HW, 3C)

    q = qkv_c[:, 0:C] * scale                                  # (1, C)
    kc = qkv_c[:, C:2 * C]
    vc = qkv_c[:, 2 * C:3 * C]
    ks = qkv_s[:, C:2 * C]                                     # (HW, C)
    vs = qkv_s[:, 2 * C:3 * C]

    hm = hm_ref[...]                                           # (C, H) head mask
    hmt = hmt_ref[...]                                         # (H, C)

    # per-head logits for CLS query vs {CLS token, spatial tokens}
    lc = jnp.dot(q * kc, hm, preferred_element_type=f32)       # (1, H)
    ls = jnp.dot(q * ks, hm, preferred_element_type=f32)       # (HW, H)

    m0 = jnp.maximum(lc, jnp.max(ls, axis=0, keepdims=True))   # (1, H)
    ec = jnp.exp(lc - m0)
    es = jnp.exp(ls - m0)
    inv = pl.reciprocal(ec + jnp.sum(es, axis=0, keepdims=True), approx=True)
    pc = ec * inv                                              # (1, H)
    ps = es * inv                                              # (HW, H)

    # broadcast head probabilities back to channels and take the weighted sum
    attn = (jnp.dot(pc, hmt, preferred_element_type=f32) * vc
            + jnp.sum(jnp.dot(ps, hmt, preferred_element_type=f32) * vs,
                      axis=0, keepdims=True))                  # (1, C)

    out = jnp.dot(attn.astype(bf16), wo_ref[...],
                  preferred_element_type=f32) + bo_ref[...]    # (1, OUT_PAD)
    o_ref[0] = out.astype(o_ref.dtype)                         # lane-dense store


def _build_selectors():
    """Static 0/1 selection matrices for the 3x3/s2 conv taps and the stride-2
    shortcut subsample (built once on host; exact, no float error)."""
    S = ROI_RES
    P = S // 2
    sel_taps = np.zeros((9, P * P, S * S), np.float32)
    for i in range(3):
        for j in range(3):
            t = i * 3 + j
            for oy in range(P):
                for ox in range(P):
                    yy = 2 * oy + i - 1          # padding = 1
                    xx = 2 * ox + j - 1
                    if 0 <= yy < S and 0 <= xx < S:
                        sel_taps[t, oy * P + ox, yy * S + xx] = 1.0
    sel_ds = np.zeros((P * P, S * S), np.float32)
    for oy in range(P):
        for ox in range(P):
            sel_ds[oy * P + ox, (2 * oy) * S + (2 * ox)] = 1.0
    return sel_taps.reshape(9 * P * P, S * S), sel_ds


def region_head(box_feats, params):
    """Fused layer4 bottleneck + attnpool. box_feats:[R,S,S,C_FEAT] -> [R,OUT_DIM]."""
    R = box_feats.shape[0]
    S = ROI_RES
    C = C_LAYER4
    H = NUM_HEADS
    dh = C // H

    bf_flat = box_feats.reshape(R, S * S, C_FEAT).astype(jnp.bfloat16)

    selc_np, selds_np = _build_selectors()
    selc = jnp.asarray(selc_np, jnp.bfloat16)                  # (9*P*P, S*S)
    selds = jnp.asarray(selds_np, jnp.bfloat16)                # (P*P,  S*S)

    w2s = params["w2"].reshape(9, C_MID, C_MID).astype(jnp.bfloat16)
    wqkv = jnp.concatenate([params["wq"], params["wk"], params["wv"]],
                           axis=1).astype(jnp.bfloat16)        # (C, 3C) packed QKV
    bqkv = jnp.concatenate([params["bq"], params["bk"], params["bv"]]
                           ).reshape(1, 3 * C)
    hm = (jnp.arange(C)[:, None] // dh == jnp.arange(H)[None, :]).astype(jnp.float32)
    hmt = jnp.transpose(hm)
    wo_pad = jnp.pad(params["wo"],
                     ((0, 0), (0, OUT_PAD - OUT_DIM))).astype(jnp.bfloat16)
    bo_pad = jnp.pad(params["bo"], (0, OUT_PAD - OUT_DIM)).reshape(1, OUT_PAD)
    pos0 = params["pos"][0:1]                                  # (1, C)  CLS pos emb
    poss = params["pos"][1:]                                   # (HW, C) spatial pos emb

    def fixed(shape):
        nd = len(shape)
        return pl.BlockSpec(shape, lambda r, _nd=nd: (0,) * _nd)

    in_specs = [
        pl.BlockSpec((1, S * S, C_FEAT), lambda r: (r, 0, 0)),  # per-ROI features
        fixed(selc.shape), fixed(selds.shape),
        fixed((C_FEAT, C_MID)), fixed((1, C_MID)),
        fixed((9, C_MID, C_MID)), fixed((1, C_MID)),
        fixed((C_MID, C)), fixed((1, C)),
        fixed((C_FEAT, C)), fixed((1, C)),
        fixed((1, C)), fixed(poss.shape),
        fixed((C, 3 * C)), fixed((1, 3 * C)),
        fixed((C, H)), fixed((H, C)),
        fixed((C, OUT_PAD)), fixed((1, OUT_PAD)),
    ]

    out = pl.pallas_call(
        functools.partial(_region_head_kernel, num_heads=H),
        out_shape=jax.ShapeDtypeStruct((R, 1, OUT_PAD), jnp.float32),
        grid=(R,),
        in_specs=in_specs,
        out_specs=pl.BlockSpec((1, 1, OUT_PAD), lambda r: (r, 0, 0)),
        compiler_params=pltpu.CompilerParams(dimension_semantics=("parallel",)),
    )(bf_flat, selc, selds,
      params["w1"].astype(jnp.bfloat16), params["b1"].reshape(1, C_MID),
      w2s, params["b2"].reshape(1, C_MID),
      params["w3"].astype(jnp.bfloat16), params["b3"].reshape(1, C),
      params["wd"].astype(jnp.bfloat16), params["bd"].reshape(1, C),
      pos0, poss, wqkv, bqkv, hm, hmt, wo_pad, bo_pad)
    return out[:, 0, :OUT_DIM]


# ----------------------------------------------------------------------------
# JAX glue: im2col, ROIAlign
# ----------------------------------------------------------------------------
def im2col(x_nhwc, kh, kw, stride, pad):
    x = jnp.pad(x_nhwc, ((0, 0), (pad, pad), (pad, pad), (0, 0)))
    N, Hp, Wp, C = x.shape
    Ho = (Hp - kh) // stride + 1
    Wo = (Wp - kw) // stride + 1
    cols = []
    for i in range(kh):
        for j in range(kw):
            cols.append(x[:, i:i + Ho * stride:stride, j:j + Wo * stride:stride, :])
    return jnp.concatenate(cols, axis=-1), Ho, Wo   # [N, Ho, Wo, kh*kw*C]


def roi_align(feat_hwc, boxes_xyxy, out_size, spatial_scale):
    # TODO(synk): ROIAlign's data-dependent bilinear gather stays in plain JAX
    # (no clean static BlockSpec / scalar-prefetch expression at this shape).
    H, W, _ = feat_hwc.shape

    def one(box):
        x1, y1, x2, y2 = (box[0] * spatial_scale, box[1] * spatial_scale,
                          box[2] * spatial_scale, box[3] * spatial_scale)
        bw = (x2 - x1) / out_size
        bh = (y2 - y1) / out_size
        xs = x1 + (jnp.arange(out_size, dtype=jnp.float32) + 0.5) * bw - 0.5
        ys = y1 + (jnp.arange(out_size, dtype=jnp.float32) + 0.5) * bh - 0.5
        y0 = jnp.floor(ys)
        x0 = jnp.floor(xs)
        wy1 = ys - y0
        wx1 = xs - x0
        wy0 = 1.0 - wy1
        wx0 = 1.0 - wx1
        y0i = jnp.clip(y0, 0, H - 1).astype(jnp.int32)
        y1i = jnp.clip(y0 + 1, 0, H - 1).astype(jnp.int32)
        x0i = jnp.clip(x0, 0, W - 1).astype(jnp.int32)
        x1i = jnp.clip(x0 + 1, 0, W - 1).astype(jnp.int32)
        f00 = feat_hwc[y0i[:, None], x0i[None, :], :]
        f01 = feat_hwc[y0i[:, None], x1i[None, :], :]
        f10 = feat_hwc[y1i[:, None], x0i[None, :], :]
        f11 = feat_hwc[y1i[:, None], x1i[None, :], :]
        w00 = (wy0[:, None] * wx0[None, :])[..., None]
        w01 = (wy0[:, None] * wx1[None, :])[..., None]
        w10 = (wy1[:, None] * wx0[None, :])[..., None]
        w11 = (wy1[:, None] * wx1[None, :])[..., None]
        return f00 * w00 + f01 * w01 + f10 * w10 + f11 * w11

    return jax.vmap(one)(boxes_xyxy)                     # [R, S, S, C]


# ----------------------------------------------------------------------------
# Parameters (synthetic, deterministic)
# ----------------------------------------------------------------------------
def init_params(key):
    def dense(k, fan_in, shape):
        return (jax.random.normal(k, shape, jnp.float32) / jnp.sqrt(fan_in)).astype(jnp.float32)

    ks = jax.random.split(key, 16)
    hw = (ROI_RES // 2) * (ROI_RES // 2)
    p = {
        # backbone stem: 3x3/s2 conv, C_IN -> C_FEAT (BN folded; eval-mode frozen model)
        "w_stem": dense(ks[0], 9 * C_IN, (9 * C_IN, C_FEAT)),
        "b_stem": dense(ks[1], 1, (C_FEAT,)) * 0.1,
        # layer4 bottleneck
        "w1": dense(ks[2], C_FEAT, (C_FEAT, C_MID)),
        "b1": dense(ks[3], 1, (C_MID,)) * 0.1,
        "w2": dense(ks[4], 9 * C_MID, (9 * C_MID, C_MID)),
        "b2": dense(ks[5], 1, (C_MID,)) * 0.1,
        "w3": dense(ks[6], C_MID, (C_MID, C_LAYER4)),
        "b3": dense(ks[7], 1, (C_LAYER4,)) * 0.1,
        "wd": dense(ks[8], C_FEAT, (C_FEAT, C_LAYER4)),
        "bd": dense(ks[9], 1, (C_LAYER4,)) * 0.1,
        # CLIP AttentionPool2d
        "pos": dense(ks[10], C_LAYER4, (hw + 1, C_LAYER4)),
        "wq": dense(ks[11], C_LAYER4, (C_LAYER4, C_LAYER4)),
        "bq": jnp.zeros((C_LAYER4,), jnp.float32),
        "wk": dense(ks[12], C_LAYER4, (C_LAYER4, C_LAYER4)),
        "bk": jnp.zeros((C_LAYER4,), jnp.float32),
        "wv": dense(ks[13], C_LAYER4, (C_LAYER4, C_LAYER4)),
        "bv": jnp.zeros((C_LAYER4,), jnp.float32),
        "wo": dense(ks[14], C_LAYER4, (C_LAYER4, OUT_DIM)),
        "bo": dense(ks[15], 1, (OUT_DIM,)) * 0.1,
    }
    return p


# ----------------------------------------------------------------------------
# Forward (bbox branch of extract_region_feature.forward)
# ----------------------------------------------------------------------------
@jax.jit
def extract_region_feature_forward(params, img_nchw, bbox):
    # layout: input is NCHW (PyTorch); converted to NHWC internally.
    x, y, w, h = bbox
    boxes = jnp.stack([x, y, x + w, y + h], axis=0).T            # [R, 4] xyxy

    img = jnp.transpose(img_nchw, (0, 2, 3, 1)).astype(jnp.float32)  # NHWC
    # preprocess_image: normalize
    img = (img - 127.5) / 127.5

    # backbone stem conv (Pallas bf16 matmul over im2col patches)
    # TODO(synk): fold the im2col into the kernel (tap grid axis + accumulator)
    # for real image sizes; at 32x32 the inflated cols tensor is ~27 KB.
    cols, Ho, Wo = im2col(img, 3, 3, STEM_STRIDE, 1)
    feat = stem_conv_matmul(cols.reshape(-1, 9 * C_IN), params["w_stem"],
                            params["b_stem"])
    feat = feat.reshape(img.shape[0], Ho, Wo, C_FEAT)            # [1, 16, 16, C]

    # _shared_roi_transform: ROIAlign (image 0) + fused layer4 + attnpool
    spatial_scale = 1.0 / STEM_STRIDE
    box_feats = roi_align(feat[0], boxes, ROI_RES, spatial_scale)  # [R, 8, 8, C]

    # fused layer4 bottleneck + CLIP AttentionPool2d (single Pallas kernel,
    # gridded over ROIs, all intermediates in VMEM) -> region features
    region_feats = region_head(box_feats, params)                # [R, OUT_DIM]
    return region_feats


if __name__ == "__main__":
    key = jax.random.PRNGKey(0)
    kp, ki = jax.random.split(key)
    params = init_params(kp)

    img = (jax.random.uniform(ki, (1, C_IN, IMG_SIZE, IMG_SIZE)) * 255.0).astype(jnp.float32)
    bbox = (jnp.array([2.0, 10.0]),   # x
            jnp.array([3.0, 4.0]),    # y
            jnp.array([20.0, 12.0]),  # w
            jnp.array([18.0, 16.0]))  # h  -> 2 boxes

    region_feats = extract_region_feature_forward(params, img, bbox)
    region_feats = jax.block_until_ready(region_feats)
    assert region_feats.shape == (2, OUT_DIM)
    assert bool(jnp.all(jnp.isfinite(region_feats)))
    print("KERNEL_OK")
</pallas_src>

<mosaic_0001>
module attributes {stable_mosaic.version = 11 : i64} {
  func.func @_stem_matmul_kernel(%arg0: memref<256x27xbf16, #tpu.memory_space<vmem>>, %arg1: memref<27x16xbf16, #tpu.memory_space<vmem>>, %arg2: memref<1x16xf32, #tpu.memory_space<vmem>>, %arg3: memref<256x16xf32, #tpu.memory_space<vmem>>) attributes {dimension_semantics = [], scalar_prefetch = 0 : i64, scratch_operands = 0 : i64, tpu.core_type = #tpu.core_type<tc>} {
    %c0 = arith.constant 0 : index
    %c0_0 = arith.constant 0 : index
    %0 = vector.load %arg0[%c0, %c0_0] : memref<256x27xbf16, #tpu.memory_space<vmem>>, vector<256x27xbf16>
    %c0_1 = arith.constant 0 : index
    %c0_2 = arith.constant 0 : index
    %1 = vector.load %arg1[%c0_1, %c0_2] : memref<27x16xbf16, #tpu.memory_space<vmem>>, vector<27x16xbf16>
    %cst = arith.constant dense<0.000000e+00> : vector<256x16xf32>
    %2 = tpu.matmul %0, %1, %cst {dimension_numbers = #tpu.dot_dimension_numbers<[1], [0], [0], [1], [0, 0, 1, 1], [], []>} : vector<256x27xbf16>, vector<27x16xbf16>, vector<256x16xf32> -> vector<256x16xf32>
    %c0_3 = arith.constant 0 : index
    %c0_4 = arith.constant 0 : index
    %3 = vector.load %arg2[%c0_3, %c0_4] : memref<1x16xf32, #tpu.memory_space<vmem>>, vector<1x16xf32>
    %4 = vector.broadcast %3 : vector<1x16xf32> to vector<256x16xf32>
    %5 = arith.addf %2, %4 : vector<256x16xf32>
    %cst_5 = arith.constant 0.000000e+00 : f32
    %6 = vector.broadcast %cst_5 : f32 to vector<256x16xf32>
    %7 = arith.maximumf %5, %6 : vector<256x16xf32>
    %c0_6 = arith.constant 0 : index
    %c0_7 = arith.constant 0 : index
    %8 = vector.load %arg3[%c0_6, %c0_7] : memref<256x16xf32, #tpu.memory_space<vmem>>, vector<256x16xf32>
    tpu.vector_store %arg3[%c0_6, %c0_7], %7 {strides = array<i32>} : memref<256x16xf32, #tpu.memory_space<vmem>>, vector<256x16xf32>,
    return
  }
}

module attributes {stable_mosaic.version = 11 : i64} {
  func.func @_region_head_kernel(%arg0: i32, %arg1: memref<1x64x16xbf16, #tpu.memory_space<vmem>>, %arg2: memref<144x64xbf16, #tpu.memory_space<vmem>>, %arg3: memref<16x64xbf16, #tpu.memory_space<vmem>>, %arg4: memref<16x8xbf16, #tpu.memory_space<vmem>>, %arg5: memref<1x8xf32, #tpu.memory_space<vmem>>, %arg6: memref<9x8x8xbf16, #tpu.memory_space<vmem>>, %arg7: memref<1x8xf32, #tpu.memory_space<vmem>>, %arg8: memref<8x32xbf16, #tpu.memory_space<vmem>>, %arg9: memref<1x32xf32, #tpu.memory_space<vmem>>, %arg10: memref<16x32xbf16, #tpu.memory_space<vmem>>, %arg11: memref<1x32xf32, #tpu.memory_space<vmem>>, %arg12: memref<1x32xf32, #tpu.memory_space<vmem>>, %arg13: memref<16x32xf32, #tpu.memory_space<vmem>>, %arg14: memref<32x96xbf16, #tpu.memory_space<vmem>>, %arg15: memref<1x96xf32, #tpu.memory_space<vmem>>, %arg16: memref<32x4xf32, #tpu.memory_space<vmem>>, %arg17: memref<4x32xf32, #tpu.memory_space<vmem>>, %arg18: memref<32x128xbf16, #tpu.memory_space<vmem>>, %arg19: memref<1x128xf32, #tpu.memory_space<vmem>>, %arg20: memref<1x1x128xf32, #tpu.memory_space<vmem>>) attributes {dimension_semantics = [#tpu.dimension_semantics<parallel>], iteration_bounds = array<i64: 2>, scalar_prefetch = 0 : i64, scratch_operands = 0 : i64, tpu.core_type = #tpu.core_type<tc>, window_params = [{transform_indices = @transform_0, window_bounds = array<i64: 1, 64, 16>}, {pipeline_mode = #tpu.pipeline_mode<synchronous>, transform_indices = @transform_1, window_bounds = array<i64: 144, 64>}, {pipeline_mode = #tpu.pipeline_mode<synchronous>, transform_indices = @transform_2, window_bounds = array<i64: 16, 64>}, {pipeline_mode = #tpu.pipeline_mode<synchronous>, transform_indices = @transform_3, window_bounds = array<i64: 16, 8>}, {pipeline_mode = #tpu.pipeline_mode<synchronous>, transform_indices = @transform_4, window_bounds = array<i64: 1, 8>}, {pipeline_mode = #tpu.pipeline_mode<synchronous>, transform_indices = @transform_5, window_bounds = array<i64: 9, 8, 8>}, {pipeline_mode = #tpu.pipeline_mode<synchronous>, transform_indices = @transform_6, window_bounds = array<i64: 1, 8>}, {pipeline_mode = #tpu.pipeline_mode<synchronous>, transform_indices = @transform_7, window_bounds = array<i64: 8, 32>}, {pipeline_mode = #tpu.pipeline_mode<synchronous>, transform_indices = @transform_8, window_bounds = array<i64: 1, 32>}, {pipeline_mode = #tpu.pipeline_mode<synchronous>, transform_indices = @transform_9, window_bounds = array<i64: 16, 32>}, {pipeline_mode = #tpu.pipeline_mode<synchronous>, transform_indices = @transform_10, window_bounds = array<i64: 1, 32>}, {pipeline_mode = #tpu.pipeline_mode<synchronous>, transform_indices = @transform_11, window_bounds = array<i64: 1, 32>}, {pipeline_mode = #tpu.pipeline_mode<synchronous>, transform_indices = @transform_12, window_bounds = array<i64: 16, 32>}, {pipeline_mode = #tpu.pipeline_mode<synchronous>, transform_indices = @transform_13, window_bounds = array<i64: 32, 96>}, {pipeline_mode = #tpu.pipeline_mode<synchronous>, transform_indices = @transform_14, window_bounds = array<i64: 1, 96>}, {pipeline_mode = #tpu.pipeline_mode<synchronous>, transform_indices = @transform_15, window_bounds = array<i64: 32, 4>}, {pipeline_mode = #tpu.pipeline_mode<synchronous>, transform_indices = @transform_16, window_bounds = array<i64: 4, 32>}, {pipeline_mode = #tpu.pipeline_mode<synchronous>, transform_indices = @transform_17, window_bounds = array<i64: 32, 128>}, {pipeline_mode = #tpu.pipeline_mode<synchronous>, transform_indices = @transform_18, window_bounds = array<i64: 1, 128>}, {transform_indices = @transform_19, window_bounds = array<i64: 1, 1, 128>}]} {
    %c0 = arith.constant 0 : index
    %c0_0 = arith.constant 0 : index
    %c0_1 = arith.constant 0 : index
    %0 = vector.load %arg1[%c0, %c0_0, %c0_1] : memref<1x64x16xbf16, #tpu.memory_space<vmem>>, vector<1x64x16xbf16>
    %1 = vector.shape_cast %0 : vector<1x64x16xbf16> to vector<64x16xbf16>
    %c0_2 = arith.constant 0 : index
    %c0_3 = arith.constant 0 : index
    %2 = vector.load %arg4[%c0_2, %c0_3] : memref<16x8xbf16, #tpu.memory_space<vmem>>, vector<16x8xbf16>
    %cst = arith.constant dense<0.000000e+00> : vector<64x8xf32>
    %3 = tpu.matmul %1, %2, %cst {dimension_numbers = #tpu.dot_dimension_numbers<[1], [0], [0], [1], [0, 0, 1, 1], [], []>} : vector<64x16xbf16>, vector<16x8xbf16>, vector<64x8xf32> -> vector<64x8xf32>
    %c0_4 = arith.constant 0 : index
    %c0_5 = arith.constant 0 : index
    %4 = vector.load %arg5[%c0_4, %c0_5] : memref<1x8xf32, #tpu.memory_space<vmem>>, vector<1x8xf32>
    %5 = vector.broadcast %4 : vector<1x8xf32> to vector<64x8xf32>
    %6 = arith.addf %3, %5 : vector<64x8xf32>
    %cst_6 = arith.constant 0.000000e+00 : f32
    %7 = vector.broadcast %cst_6 : f32 to vector<64x8xf32>
    %8 = arith.maximumf %6, %7 : vector<64x8xf32>
    %9 = arith.truncf %8 : vector<64x8xf32> to vector<64x8xbf16>
    %c0_7 = arith.constant 0 : index
    %c0_8 = arith.constant 0 : index
    %10 = vector.load %arg2[%c0_7, %c0_8] : memref<144x64xbf16, #tpu.memory_space<vmem>>, vector<144x64xbf16>
    %cst_9 = arith.constant dense<0.000000e+00> : vector<144x8xf32>
    %11 = tpu.matmul %10, %9, %cst_9 {dimension_numbers = #tpu.dot_dimension_numbers<[1], [0], [0], [1], [0, 0, 1, 1], [], []>} : vector<144x64xbf16>, vector<64x8xbf16>, vector<144x8xf32> -> vector<144x8xf32>
    %cst_10 = arith.constant 0.000000e+00 : f32
    %12 = vector.broadcast %cst_10 : f32 to vector<16x8xf32>
    %13 = vector.extract_strided_slice %11 {offsets = [0, 0], sizes = [16, 8], strides = [1, 1]} : vector<144x8xf32> to vector<16x8xf32>
    %14 = arith.truncf %13 : vector<16x8xf32> to vector<16x8xbf16>
    %c0_11 = arith.constant 0 : index
    %c0_12 = arith.constant 0 : index
    %c0_13 = arith.constant 0 : index
    %15 = vector.load %arg6[%c0_11, %c0_12, %c0_13] : memref<9x8x8xbf16, #tpu.memory_space<vmem>>, vector<1x8x8xbf16>
    %16 = vector.shape_cast %15 : vector<1x8x8xbf16> to vector<8x8xbf16>
    %cst_14 = arith.constant dense<0.000000e+00> : vector<16x8xf32>
    %17 = tpu.matmul %14, %16, %cst_14 {dimension_numbers = #tpu.dot_dimension_numbers<[1], [0], [0], [1], [0, 0, 1, 1], [], []>} : vector<16x8xbf16>, vector<8x8xbf16>, vector<16x8xf32> -> vector<16x8xf32>
    %18 = arith.addf %12, %17 : vector<16x8xf32>
    %19 = vector.extract_strided_slice %11 {offsets = [16, 0], sizes = [16, 8], strides = [1, 1]} : vector<144x8xf32> to vector<16x8xf32>
    %20 = arith.truncf %19 : vector<16x8xf32> to vector<16x8xbf16>
    %c1 = arith.constant 1 : index
    %c0_15 = arith.constant 0 : index
    %c0_16 = arith.constant 0 : index
    %21 = vector.load %arg6[%c1, %c0_15, %c0_16] : memref<9x8x8xbf16, #tpu.memory_space<vmem>>, vector<1x8x8xbf16>
    %22 = vector.shape_cast %21 : vector<1x8x8xbf16> to vector<8x8xbf16>
    %cst_17 = arith.constant dense<0.000000e+00> : vector<16x8xf32>
    %23 = tpu.matmul %20, %22, %cst_17 {dimension_numbers = #tpu.dot_dimension_numbers<[1], [0], [0], [1], [0, 0, 1, 1], [], []>} : vector<16x8xbf16>, vector<8x8xbf16>, vector<16x8xf32> -> vector<16x8xf32>
    %24 = arith.addf %18, %23 : vector<16x8xf32>
    %25 = vector.extract_strided_slice %11 {offsets = [32, 0], sizes = [16, 8], strides = [1, 1]} : vector<144x8xf32> to vector<16x8xf32>
    %26 = arith.truncf %25 : vector<16x8xf32> to vector<16x8xbf16>
    %c2 = arith.constant 2 : index
    %c0_18 = arith.constant 0 : index
    %c0_19 = arith.constant 0 : index
    %27 = vector.load %arg6[%c2, %c0_18, %c0_19] : memref<9x8x8xbf16, #tpu.memory_space<vmem>>, vector<1x8x8xbf16>
    %28 = vector.shape_cast %27 : vector<1x8x8xbf16> to vector<8x8xbf16>
    %cst_20 = arith.constant dense<0.000000e+00> : vector<16x8xf32>
    %29 = tpu.matmul %26, %28, %cst_20 {dimension_numbers = #tpu.dot_dimension_numbers<[1], [0], [0], [1], [0, 0, 1, 1], [], []>} : vector<16x8xbf16>, vector<8x8xbf16>, vector<16x8xf32> -> vector<16x8xf32>
    %30 = arith.addf %24, %29 : vector<16x8xf32>
    %31 = vector.extract_strided_slice %11 {offsets = [48, 0], sizes = [16, 8], strides = [1, 1]} : vector<144x8xf32> to vector<16x8xf32>
    %32 = arith.truncf %31 : vector<16x8xf32> to vector<16x8xbf16>
    %c3 = arith.constant 3 : index
    %c0_21 = arith.constant 0 : index
    %c0_22 = arith.constant 0 : index
    %33 = vector.load %arg6[%c3, %c0_21, %c0_22] : memref<9x8x8xbf16, #tpu.memory_space<vmem>>, vector<1x8x8xbf16>
    %34 = vector.shape_cast %33 : vector<1x8x8xbf16> to vector<8x8xbf16>
    %cst_23 = arith.constant dense<0.000000e+00> : vector<16x8xf32>
    %35 = tpu.matmul %32, %34, %cst_23 {dimension_numbers = #tpu.dot_dimension_numbers<[1], [0], [0], [1], [0, 0, 1, 1], [], []>} : vector<16x8xbf16>, vector<8x8xbf16>, vector<16x8xf32> -> vector<16x8xf32>
    %36 = arith.addf %30, %35 : vector<16x8xf32>
    %37 = vector.extract_strided_slice %11 {offsets = [64, 0], sizes = [16, 8], strides = [1, 1]} : vector<144x8xf32> to vector<16x8xf32>
    %38 = arith.truncf %37 : vector<16x8xf32> to vector<16x8xbf16>
    %c4 = arith.constant 4 : index
    %c0_24 = arith.constant 0 : index
    %c0_25 = arith.constant 0 : index
    %39 = vector.load %arg6[%c4, %c0_24, %c0_25] : memref<9x8x8xbf16, #tpu.memory_space<vmem>>, vector<1x8x8xbf16>
    %40 = vector.shape_cast %39 : vector<1x8x8xbf16> to vector<8x8xbf16>
    %cst_26 = arith.constant dense<0.000000e+00> : vector<16x8xf32>
    %41 = tpu.matmul %38, %40, %cst_26 {dimension_numbers = #tpu.dot_dimension_numbers<[1], [0], [0], [1], [0, 0, 1, 1], [], []>} : vector<16x8xbf16>, vector<8x8xbf16>, vector<16x8xf32> -> vector<16x8xf32>
    %42 = arith.addf %36, %41 : vector<16x8xf32>
    %43 = vector.extract_strided_slice %11 {offsets = [80, 0], sizes = [16, 8], strides = [1, 1]} : vector<144x8xf32> to vector<16x8xf32>
    %44 = arith.truncf %43 : vector<16x8xf32> to vector<16x8xbf16>
    %c5 = arith.constant 5 : index
    %c0_27 = arith.constant 0 : index
    %c0_28 = arith.constant 0 : index
    %45 = vector.load %arg6[%c5, %c0_27, %c0_28] : memref<9x8x8xbf16, #tpu.memory_space<vmem>>, vector<1x8x8xbf16>
    %46 = vector.shape_cast %45 : vector<1x8x8xbf16> to vector<8x8xbf16>
    %cst_29 = arith.constant dense<0.000000e+00> : vector<16x8xf32>
    %47 = tpu.matmul %44, %46, %cst_29 {dimension_numbers = #tpu.dot_dimension_numbers<[1], [0], [0], [1], [0, 0, 1, 1], [], []>} : vector<16x8xbf16>, vector<8x8xbf16>, vector<16x8xf32> -> vector<16x8xf32>
    %48 = arith.addf %42, %47 : vector<16x8xf32>
    %49 = vector.extract_strided_slice %11 {offsets = [96, 0], sizes = [16, 8], strides = [1, 1]} : vector<144x8xf32> to vector<16x8xf32>
    %50 = arith.truncf %49 : vector<16x8xf32> to vector<16x8xbf16>
    %c6 = arith.constant 6 : index
    %c0_30 = arith.constant 0 : index
    %c0_31 = arith.constant 0 : index
    %51 = vector.load %arg6[%c6, %c0_30, %c0_31] : memref<9x8x8xbf16, #tpu.memory_space<vmem>>, vector<1x8x8xbf16>
    %52 = vector.shape_cast %51 : vector<1x8x8xbf16> to vector<8x8xbf16>
    %cst_32 = arith.constant dense<0.000000e+00> : vector<16x8xf32>
    %53 = tpu.matmul %50, %52, %cst_32 {dimension_numbers = #tpu.dot_dimension_numbers<[1], [0], [0], [1], [0, 0, 1, 1], [], []>} : vector<16x8xbf16>, vector<8x8xbf16>, vector<16x8xf32> -> vector<16x8xf32>
    %54 = arith.addf %48, %53 : vector<16x8xf32>
    %55 = vector.extract_strided_slice %11 {offsets = [112, 0], sizes = [16, 8], strides = [1, 1]} : vector<144x8xf32> to vector<16x8xf32>
    %56 = arith.truncf %55 : vector<16x8xf32> to vector<16x8xbf16>
    %c7 = arith.constant 7 : index
    %c0_33 = arith.constant 0 : index
    %c0_34 = arith.constant 0 : index
    %57 = vector.load %arg6[%c7, %c0_33, %c0_34] : memref<9x8x8xbf16, #tpu.memory_space<vmem>>, vector<1x8x8xbf16>
    %58 = vector.shape_cast %57 : vector<1x8x8xbf16> to vector<8x8xbf16>
    %cst_35 = arith.constant dense<0.000000e+00> : vector<16x8xf32>
    %59 = tpu.matmul %56, %58, %cst_35 {dimension_numbers = #tpu.dot_dimension_numbers<[1], [0], [0], [1], [0, 0, 1, 1], [], []>} : vector<16x8xbf16>, vector<8x8xbf16>, vector<16x8xf32> -> vector<16x8xf32>
    %60 = arith.addf %54, %59 : vector<16x8xf32>
    %61 = vector.extract_strided_slice %11 {offsets = [128, 0], sizes = [16, 8], strides = [1, 1]} : vector<144x8xf32> to vector<16x8xf32>
    %62 = arith.truncf %61 : vector<16x8xf32> to vector<16x8xbf16>
    %c8 = arith.constant 8 : index
    %c0_36 = arith.constant 0 : index
    %c0_37 = arith.constant 0 : index
    %63 = vector.load %arg6[%c8, %c0_36, %c0_37] : memref<9x8x8xbf16, #tpu.memory_space<vmem>>, vector<1x8x8xbf16>
    %64 = vector.shape_cast %63 : vector<1x8x8xbf16> to vector<8x8xbf16>
    %cst_38 = arith.constant dense<0.000000e+00> : vector<16x8xf32>
    %65 = tpu.matmul %62, %64, %cst_38 {dimension_numbers = #tpu.dot_dimension_numbers<[1], [0], [0], [1], [0, 0, 1, 1], [], []>} : vector<16x8xbf16>, vector<8x8xbf16>, vector<16x8xf32> -> vector<16x8xf32>
    %66 = arith.addf %60, %65 : vector<16x8xf32>
    %c0_39 = arith.constant 0 : index
    %c0_40 = arith.constant 0 : index
    %67 = vector.load %arg7[%c0_39, %c0_40] : memref<1x8xf32, #tpu.memory_space<vmem>>, vector<1x8xf32>
    %68 = vector.broadcast %67 : vector<1x8xf32> to vector<16x8xf32>
    %69 = arith.addf %66, %68 : vector<16x8xf32>
    %cst_41 = arith.constant 0.000000e+00 : f32
    %70 = vector.broadcast %cst_41 : f32 to vector<16x8xf32>
    %71 = arith.maximumf %69, %70 : vector<16x8xf32>
    %72 = arith.truncf %71 : vector<16x8xf32> to vector<16x8xbf16>
    %c0_42 = arith.constant 0 : index
    %c0_43 = arith.constant 0 : index
    %73 = vector.load %arg3[%c0_42, %c0_43] : memref<16x64xbf16, #tpu.memory_space<vmem>>, vector<16x64xbf16>
    %cst_44 = arith.constant dense<0.000000e+00> : vector<16x16xf32>
    %74 = tpu.matmul %73, %1, %cst_44 {dimension_numbers = #tpu.dot_dimension_numbers<[1], [0], [0], [1], [0, 0, 1, 1], [], []>} : vector<16x64xbf16>, vector<64x16xbf16>, vector<16x16xf32> -> vector<16x16xf32>
    %75 = arith.truncf %74 : vector<16x16xf32> to vector<16x16xbf16>
    %c0_45 = arith.constant 0 : index
    %c0_46 = arith.constant 0 : index
    %76 = vector.load %arg10[%c0_45, %c0_46] : memref<16x32xbf16, #tpu.memory_space<vmem>>, vector<16x32xbf16>
    %cst_47 = arith.constant dense<0.000000e+00> : vector<16x32xf32>
    %77 = tpu.matmul %75, %76, %cst_47 {dimension_numbers = #tpu.dot_dimension_numbers<[1], [0], [0], [1], [0, 0, 1, 1], [], []>} : vector<16x16xbf16>, vector<16x32xbf16>, vector<16x32xf32> -> vector<16x32xf32>
    %c0_48 = arith.constant 0 : index
    %c0_49 = arith.constant 0 : index
    %78 = vector.load %arg11[%c0_48, %c0_49] : memref<1x32xf32, #tpu.memory_space<vmem>>, vector<1x32xf32>
    %79 = vector.broadcast %78 : vector<1x32xf32> to vector<16x32xf32>
    %80 = arith.addf %77, %79 : vector<16x32xf32>
    %c0_50 = arith.constant 0 : index
    %c0_51 = arith.constant 0 : index
    %81 = vector.load %arg8[%c0_50, %c0_51] : memref<8x32xbf16, #tpu.memory_space<vmem>>, vector<8x32xbf16>
    %cst_52 = arith.constant dense<0.000000e+00> : vector<16x32xf32>
    %82 = tpu.matmul %72, %81, %cst_52 {dimension_numbers = #tpu.dot_dimension_numbers<[1], [0], [0], [1], [0, 0, 1, 1], [], []>} : vector<16x8xbf16>, vector<8x32xbf16>, vector<16x32xf32> -> vector<16x32xf32>
    %c0_53 = arith.constant 0 : index
    %c0_54 = arith.constant 0 : index
    %83 = vector.load %arg9[%c0_53, %c0_54] : memref<1x32xf32, #tpu.memory_space<vmem>>, vector<1x32xf32>
    %84 = vector.broadcast %83 : vector<1x32xf32> to vector<16x32xf32>
    %85 = arith.addf %82, %84 : vector<16x32xf32>
    %86 = arith.addf %85, %80 : vector<16x32xf32>
    %cst_55 = arith.constant 0.000000e+00 : f32
    %87 = vector.broadcast %cst_55 : f32 to vector<16x32xf32>
    %88 = arith.maximumf %86, %87 : vector<16x32xf32>
    %cst_56 = arith.constant dense<0.000000e+00> : vector<32xf32>
    %89 = vector.multi_reduction <add>, %88, %cst_56 [0] : vector<16x32xf32> to vector<32xf32>
    %90 = vector.shape_cast %89 : vector<32xf32> to vector<1x32xf32>
    %cst_57 = arith.constant 1.600000e+01 : f32
    %91 = vector.broadcast %cst_57 : f32 to vector<1x32xf32>
    %92 = arith.divf %90, %91 : vector<1x32xf32>
    %c0_58 = arith.constant 0 : index
    %c0_59 = arith.constant 0 : index
    %93 = vector.load %arg12[%c0_58, %c0_59] : memref<1x32xf32, #tpu.memory_space<vmem>>, vector<1x32xf32>
    %94 = arith.addf %92, %93 : vector<1x32xf32>
    %c0_60 = arith.constant 0 : index
    %c0_61 = arith.constant 0 : index
    %95 = vector.load %arg13[%c0_60, %c0_61] : memref<16x32xf32, #tpu.memory_space<vmem>>, vector<16x32xf32>
    %96 = arith.addf %88, %95 : vector<16x32xf32>
    %97 = arith.truncf %94 : vector<1x32xf32> to vector<1x32xbf16>
    %c0_62 = arith.constant 0 : index
    %c0_63 = arith.constant 0 : index
    %98 = vector.load %arg14[%c0_62, %c0_63] : memref<32x96xbf16, #tpu.memory_space<vmem>>, vector<32x96xbf16>
    %cst_64 = arith.constant dense<0.000000e+00> : vector<1x96xf32>
    %99 = tpu.matmul %97, %98, %cst_64 {dimension_numbers = #tpu.dot_dimension_numbers<[1], [0], [0], [1], [0, 0, 1, 1], [], []>} : vector<1x32xbf16>, vector<32x96xbf16>, vector<1x96xf32> -> vector<1x96xf32>
    %c0_65 = arith.constant 0 : index
    %c0_66 = arith.constant 0 : index
    %100 = vector.load %arg15[%c0_65, %c0_66] : memref<1x96xf32, #tpu.memory_space<vmem>>, vector<1x96xf32>
    %101 = arith.addf %99, %100 : vector<1x96xf32>
    %102 = arith.truncf %96 : vector<16x32xf32> to vector<16x32xbf16>
    %c0_67 = arith.constant 0 : index
    %c0_68 = arith.constant 0 : index
    %103 = vector.load %arg14[%c0_67, %c0_68] : memref<32x96xbf16, #tpu.memory_space<vmem>>, vector<32x96xbf16>
    %cst_69 = arith.constant dense<0.000000e+00> : vector<16x96xf32>
    %104 = tpu.matmul %102, %103, %cst_69 {dimension_numbers = #tpu.dot_dimension_numbers<[1], [0], [0], [1], [0, 0, 1, 1], [], []>} : vector<16x32xbf16>, vector<32x96xbf16>, vector<16x96xf32> -> vector<16x96xf32>
    %c0_70 = arith.constant 0 : index
    %c0_71 = arith.constant 0 : index
    %105 = vector.load %arg15[%c0_70, %c0_71] : memref<1x96xf32, #tpu.memory_space<vmem>>, vector<1x96xf32>
    %106 = vector.broadcast %105 : vector<1x96xf32> to vector<16x96xf32>
    %107 = arith.addf %104, %106 : vector<16x96xf32>
    %108 = vector.extract_strided_slice %101 {offsets = [0, 0], sizes = [1, 32], strides = [1, 1]} : vector<1x96xf32> to vector<1x32xf32>
    %cst_72 = arith.constant 0.353553385 : f32
    %109 = vector.broadcast %cst_72 : f32 to vector<1x32xf32>
    %110 = arith.mulf %108, %109 : vector<1x32xf32>
    %111 = vector.extract_strided_slice %101 {offsets = [0, 32], sizes = [1, 32], strides = [1, 1]} : vector<1x96xf32> to vector<1x32xf32>
    %112 = vector.extract_strided_slice %101 {offsets = [0, 64], sizes = [1, 32], strides = [1, 1]} : vector<1x96xf32> to vector<1x32xf32>
    %113 = vector.extract_strided_slice %107 {offsets = [0, 32], sizes = [16, 32], strides = [1, 1]} : vector<16x96xf32> to vector<16x32xf32>
    %114 = vector.extract_strided_slice %107 {offsets = [0, 64], sizes = [16, 32], strides = [1, 1]} : vector<16x96xf32> to vector<16x32xf32>
    %c0_73 = arith.constant 0 : index
    %c0_74 = arith.constant 0 : index
    %115 = vector.load %arg16[%c0_73, %c0_74] : memref<32x4xf32, #tpu.memory_space<vmem>>, vector<32x4xf32>
    %c0_75 = arith.constant 0 : index
    %c0_76 = arith.constant 0 : index
    %116 = vector.load %arg17[%c0_75, %c0_76] : memref<4x32xf32, #tpu.memory_space<vmem>>, vector<4x32xf32>
    %117 = arith.mulf %110, %111 : vector<1x32xf32>
    %cst_77 = arith.constant dense<0.000000e+00> : vector<1x4xf32>
    %118 = tpu.matmul %117, %115, %cst_77 {dimension_numbers = #tpu.dot_dimension_numbers<[1], [0], [0], [1], [0, 0, 1, 1], [], []>} : vector<1x32xf32>, vector<32x4xf32>, vector<1x4xf32> -> vector<1x4xf32>
    %119 = vector.broadcast %110 : vector<1x32xf32> to vector<16x32xf32>
    %120 = arith.mulf %119, %113 : vector<16x32xf32>
    %cst_78 = arith.constant dense<0.000000e+00> : vector<16x4xf32>
    %121 = tpu.matmul %120, %115, %cst_78 {dimension_numbers = #tpu.dot_dimension_numbers<[1], [0], [0], [1], [0, 0, 1, 1], [], []>} : vector<16x32xf32>, vector<32x4xf32>, vector<16x4xf32> -> vector<16x4xf32>
    %cst_79 = arith.constant dense<0xFF800000> : vector<4xf32>
    %122 = vector.multi_reduction <maximumf>, %121, %cst_79 [0] : vector<16x4xf32> to vector<4xf32>
    %123 = vector.shape_cast %122 : vector<4xf32> to vector<1x4xf32>
    %124 = arith.maximumf %118, %123 : vector<1x4xf32>
    %125 = arith.subf %118, %124 : vector<1x4xf32>
    %126 = math.exp %125 : vector<1x4xf32>
    %127 = vector.broadcast %124 : vector<1x4xf32> to vector<16x4xf32>
    %128 = arith.subf %121, %127 : vector<16x4xf32>
    %129 = math.exp %128 : vector<16x4xf32>
    %cst_80 = arith.constant dense<0.000000e+00> : vector<4xf32>
    %130 = vector.multi_reduction <add>, %129, %cst_80 [0] : vector<16x4xf32> to vector<4xf32>
    %131 = vector.shape_cast %130 : vector<4xf32> to vector<1x4xf32>
    %132 = arith.addf %126, %131 : vector<1x4xf32>
    %133 = tpu.reciprocal %132 {approx = true} : vector<1x4xf32> -> vector<1x4xf32>
    %134 = arith.mulf %126, %133 : vector<1x4xf32>
    %135 = vector.broadcast %133 : vector<1x4xf32> to vector<16x4xf32>
    %136 = arith.mulf %129, %135 : vector<16x4xf32>
    %cst_81 = arith.constant dense<0.000000e+00> : vector<1x32xf32>
    %137 = tpu.matmul %134, %116, %cst_81 {dimension_numbers = #tpu.dot_dimension_numbers<[1], [0], [0], [1], [0, 0, 1, 1], [], []>} : vector<1x4xf32>, vector<4x32xf32>, vector<1x32xf32> -> vector<1x32xf32>
    %138 = arith.mulf %137, %112 : vector<1x32xf32>
    %cst_82 = arith.constant dense<0.000000e+00> : vector<16x32xf32>
    %139 = tpu.matmul %136, %116, %cst_82 {dimension_numbers = #tpu.dot_dimension_numbers<[1], [0], [0], [1], [0, 0, 1, 1], [], []>} : vector<16x4xf32>, vector<4x32xf32>, vector<16x32xf32> -> vector<16x32xf32>
    %140 = arith.mulf %139, %114 : vector<16x32xf32>
    %cst_83 = arith.constant dense<0.000000e+00> : vector<32xf32>
    %141 = vector.multi_reduction <add>, %140, %cst_83 [0] : vector<16x32xf32> to vector<32xf32>
    %142 = vector.shape_cast %141 : vector<32xf32> to vector<1x32xf32>
    %143 = arith.addf %138, %142 : vector<1x32xf32>
    %144 = arith.truncf %143 : vector<1x32xf32> to vector<1x32xbf16>
    %c0_84 = arith.constant 0 : index
    %c0_85 = arith.constant 0 : index
    %145 = vector.load %arg18[%c0_84, %c0_85] : memref<32x128xbf16, #tpu.memory_space<vmem>>, vector<32x128xbf16>
    %cst_86 = arith.constant dense<0.000000e+00> : vector<1x128xf32>
    %146 = tpu.matmul %144, %145, %cst_86 {dimension_numbers = #tpu.dot_dimension_numbers<[1], [0], [0], [1], [0, 0, 1, 1], [], []>} : vector<1x32xbf16>, vector<32x128xbf16>, vector<1x128xf32> -> vector<1x128xf32>
    %c0_87 = arith.constant 0 : index
    %c0_88 = arith.constant 0 : index
    %147 = vector.load %arg19[%c0_87, %c0_88] : memref<1x128xf32, #tpu.memory_space<vmem>>, vector<1x128xf32>
    %148 = arith.addf %146, %147 : vector<1x128xf32>
    %c0_89 = arith.constant 0 : index
    %c0_90 = arith.constant 0 : index
    %c0_91 = arith.constant 0 : index
    %149 = vector.load %arg20[%c0_89, %c0_90, %c0_91] : memref<1x1x128xf32, #tpu.memory_space<vmem>>, vector<1x1x128xf32>
    %150 = vector.shape_cast %149 : vector<1x1x128xf32> to vector<1x128xf32>
    %151 = vector.shape_cast %148 : vector<1x128xf32> to vector<1x1x128xf32>
    tpu.vector_store %arg20[%c0_89, %c0_90, %c0_91], %151 {strides = array<i32>} : memref<1x1x128xf32, #tpu.memory_space<vmem>>, vector<1x1x128xf32>,
    return
  }
  func.func @transform_0(%arg0: i32) -> (i32, i32, i32) {
    %c0_i32 = arith.constant 0 : i32
    %c0_i32_0 = arith.constant 0 : i32
    %c0_i32_1 = arith.constant 0 : i32
    return %arg0, %c0_i32, %c0_i32_0 : i32, i32, i32
  }
  func.func @transform_1(%arg0: i32) -> (i32, i32) {
    %c0_i32 = arith.constant 0 : i32
    %c0_i32_0 = arith.constant 0 : i32
    %c0_i32_1 = arith.constant 0 : i32
    return %c0_i32, %c0_i32_0 : i32, i32
  }
  func.func @transform_2(%arg0: i32) -> (i32, i32) {
    %c0_i32 = arith.constant 0 : i32
    %c0_i32_0 = arith.constant 0 : i32
    %c0_i32_1 = arith.constant 0 : i32
    return %c0_i32, %c0_i32_0 : i32, i32
  }
  func.func @transform_3(%arg0: i32) -> (i32, i32) {
    %c0_i32 = arith.constant 0 : i32
    %c0_i32_0 = arith.constant 0 : i32
    %c0_i32_1 = arith.constant 0 : i32
    return %c0_i32, %c0_i32_0 : i32, i32
  }
  func.func @transform_4(%arg0: i32) -> (i32, i32) {
    %c0_i32 = arith.constant 0 : i32
    %c0_i32_0 = arith.constant 0 : i32
    %c0_i32_1 = arith.constant 0 : i32
    return %c0_i32, %c0_i32_0 : i32, i32
  }
  func.func @transform_5(%arg0: i32) -> (i32, i32, i32) {
    %c0_i32 = arith.constant 0 : i32
    %c0_i32_0 = arith.constant 0 : i32
    %c0_i32_1 = arith.constant 0 : i32
    %c0_i32_2 = arith.constant 0 : i32
    return %c0_i32, %c0_i32_0, %c0_i32_1 : i32, i32, i32
  }
  func.func @transform_6(%arg0: i32) -> (i32, i32) {
    %c0_i32 = arith.constant 0 : i32
    %c0_i32_0 = arith.constant 0 : i32
    %c0_i32_1 = arith.constant 0 : i32
    return %c0_i32, %c0_i32_0 : i32, i32
  }
  func.func @transform_7(%arg0: i32) -> (i32, i32) {
    %c0_i32 = arith.constant 0 : i32
    %c0_i32_0 = arith.constant 0 : i32
    %c0_i32_1 = arith.constant 0 : i32
    return %c0_i32, %c0_i32_0 : i32, i32
  }
  func.func @transform_8(%arg0: i32) -> (i32, i32) {
    %c0_i32 = arith.constant 0 : i32
    %c0_i32_0 = arith.constant 0 : i32
    %c0_i32_1 = arith.constant 0 : i32
    return %c0_i32, %c0_i32_0 : i32, i32
  }
  func.func @transform_9(%arg0: i32) -> (i32, i32) {
    %c0_i32 = arith.constant 0 : i32
    %c0_i32_0 = arith.constant 0 : i32
    %c0_i32_1 = arith.constant 0 : i32
    return %c0_i32, %c0_i32_0 : i32, i32
  }
  func.func @transform_10(%arg0: i32) -> (i32, i32) {
    %c0_i32 = arith.constant 0 : i32
    %c0_i32_0 = arith.constant 0 : i32
    %c0_i32_1 = arith.constant 0 : i32
    return %c0_i32, %c0_i32_0 : i32, i32
  }
  func.func @transform_11(%arg0: i32) -> (i32, i32) {
    %c0_i32 = arith.constant 0 : i32
    %c0_i32_0 = arith.constant 0 : i32
    %c0_i32_1 = arith.constant 0 : i32
    return %c0_i32, %c0_i32_0 : i32, i32
  }
  func.func @transform_12(%arg0: i32) -> (i32, i32) {
    %c0_i32 = arith.constant 0 : i32
    %c0_i32_0 = arith.constant 0 : i32
    %c0_i32_1 = arith.constant 0 : i32
    return %c0_i32, %c0_i32_0 : i32, i32
  }
  func.func @transform_13(%arg0: i32) -> (i32, i32) {
    %c0_i32 = arith.constant 0 : i32
    %c0_i32_0 = arith.constant 0 : i32
    %c0_i32_1 = arith.constant 0 : i32
    return %c0_i32, %c0_i32_0 : i32, i32
  }
  func.func @transform_14(%arg0: i32) -> (i32, i32) {
    %c0_i32 = arith.constant 0 : i32
    %c0_i32_0 = arith.constant 0 : i32
    %c0_i32_1 = arith.constant 0 : i32
    return %c0_i32, %c0_i32_0 : i32, i32
  }
  func.func @transform_15(%arg0: i32) -> (i32, i32) {
    %c0_i32 = arith.constant 0 : i32
    %c0_i32_0 = arith.constant 0 : i32
    %c0_i32_1 = arith.constant 0 : i32
    return %c0_i32, %c0_i32_0 : i32, i32
  }
  func.func @transform_16(%arg0: i32) -> (i32, i32) {
    %c0_i32 = arith.constant 0 : i32
    %c0_i32_0 = arith.constant 0 : i32
    %c0_i32_1 = arith.constant 0 : i32
    return %c0_i32, %c0_i32_0 : i32, i32
  }
  func.func @transform_17(%arg0: i32) -> (i32, i32) {
    %c0_i32 = arith.constant 0 : i32
    %c0_i32_0 = arith.constant 0 : i32
    %c0_i32_1 = arith.constant 0 : i32
    return %c0_i32, %c0_i32_0 : i32, i32
  }
  func.func @transform_18(%arg0: i32) -> (i32, i32) {
    %c0_i32 = arith.constant 0 : i32
    %c0_i32_0 = arith.constant 0 : i32
    %c0_i32_1 = arith.constant 0 : i32
    return %c0_i32, %c0_i32_0 : i32, i32
  }
  func.func @transform_19(%arg0: i32) -> (i32, i32, i32) {
    %c0_i32 = arith.constant 0 : i32
    %c0_i32_0 = arith.constant 0 : i32
    %c0_i32_1 = arith.constant 0 : i32
    return %arg0, %c0_i32, %c0_i32_0 : i32, i32, i32
  }
}

</mosaic_0001>

<bundles_post_ra>
// kernel: extract_region_feature_forward.2
= control target key start
LH: loop header
LB: loop body
LE: loop exit
PB: predicated region body
PF: predicated region fallthrough
CT: control target
= control target key end

     0   :  { %vm198_vm0 = vcmask 1044480   ;;  %vm199_vm1 = vcmask 1045504   ;;  %vm149_vm2 = vcmask 220160   ;;  %v547_v1 = vmov 65535   ;;  %s803_s1 = inlined_call_operand.vmem [shape: bf16[27,16], index: 1, kind: input, shape index: {}]   ;;  %s804_s0 = inlined_call_operand.vmem [shape: bf16[256,27], index: 0, kind: input, shape index: {}]   ;;  %s805_s2 = inlined_call_operand.vmem [shape: f32[1,16], index: 2, kind: input, shape index: {}]   ;;  %s806_s3 = inlined_call_operand.vmem [shape: f32[256,16], index: 3, kind: output, shape index: {}]  }
   0x1   :  { %v529_v0 = vld [vmem:[%s803_s1] sm:$0xff]   ;;  %v200_v2 = vsel %vm198_vm0, 4294967295, %v547_v1  ;;  %v530_v3 = vld [vmem:[%s803_s1 + $0x8] sm:$0x3f]   ;;  %v535_v10 = vld [vmem:[%s804_s0 + $0x10] sm:$0xff]   ;;  %vm398_vm3 = vcmask 130048  }
   0x2   :  { %488 = vmatprep.subr.bf16.mxu0 %v529_v0  ;;  %524 = vmatprep.subr.bf16.mxu1 %v529_v0  ;;  %v201_v4 = vsel %vm199_vm1, %v200_v2, 0  ;;  %v531_v5 = vld [vmem:[%s804_s0] sm:$0xff]   ;;  %v533_v8 = vld [vmem:[%s804_s0 + $0x8] sm:$0xff]   ;;  %v536_v11 = vld [vmem:[%s804_s0 + $0x50] sm:$0xff]  }
   0x3   :  { %489 = vmatpush3.bf16.msra.mxu0 %v529_v0  ;;  %526 = vmatpush3.bf16.msra.mxu1 %v529_v0  ;;  %v203_v6 = vand.u32 %v530_v3, %v201_v4  ;;  %v532_v7 = vld [vmem:[%s804_s0 + $0x40] sm:$0xff]   ;;  %v534_v9 = vld [vmem:[%s804_s0 + $0x48] sm:$0xff]   ;;  %v537_v12 = vld [vmem:[%s804_s0 + $0x18] sm:$0xff]  }
   0x4   :  { %492 = vmatprep.mubr.msk.bf16.mxu0 %vm149_vm2, %v531_v5  ;;  %508 = vmatprep.mubr.msk.bf16.mxu1 %vm149_vm2, %v532_v7  ;;  %v538_v13 = vld [vmem:[%s804_s0 + $0x58] sm:$0xff]   ;;  %v539_v14 = vld [vmem:[%s804_s0 + $0x20] sm:$0xff]   ;;  %v541_v16 = vld [vmem:[%s804_s0 + $0x28] sm:$0xff]  }
   0x5   :  { %490 = vmatprep.subr.bf16.mxu0 %v203_v6  ;;  %525 = vmatprep.subr.bf16.mxu1 %v203_v6  ;;  %v540_v15 = vld [vmem:[%s804_s0 + $0x60] sm:$0xff]   ;;  %v542_v17 = vld [vmem:[%s804_s0 + $0x68] sm:$0xff]   ;;  %v543_v18 = vld [vmem:[%s804_s0 + $0x30] sm:$0xff]  }
   0x6   :  { %v544_v19 = vld [vmem:[%s804_s0 + $0x70] sm:$0xff]   ;;  %v545_v20 = vld [vmem:[%s804_s0 + $0x38] sm:$0xff]   ;;  %v641_v22 = vld [vmem:[%s805_s2] ss:$0 sm:$0xff] }
   0x7   :  { %491 = vmatpush3.bf16.msra.mxu0 %v203_v6  ;;  %527 = vmatpush3.bf16.msra.mxu1 %v203_v6  ;;  %v546_v21 = vld [vmem:[%s804_s0 + $0x78] sm:$0xff]  }
   0xa   :  { %493 = vmatmul.mubr.msk.bf16.vlgmr.msra.gmra.mrb[0].mxu0 %vm149_vm2, %v533_v8  ;;  %509 = vmatmul.mubr.msk.bf16.vlgmr.msra.gmra.mrb[0].mxu1 %vm149_vm2, %v534_v9 }
   0xb   :  { %496 = vmatprep.mubr.msk.bf16.mxu0 %vm149_vm2, %v535_v10  ;;  %512 = vmatprep.mubr.msk.bf16.mxu1 %vm149_vm2, %v536_v11 }
  0x12   :  { %497 = vmatmul.mubr.msk.bf16.gmra.mrb[4].mxu0 %vm149_vm2, %v537_v12  ;;  %513 = vmatmul.mubr.msk.bf16.gmra.mrb[4].mxu1 %vm149_vm2, %v538_v13 }
  0x13   :  { %500 = vmatprep.mubr.msk.bf16.mxu0 %vm149_vm2, %v539_v14  ;;  %516 = vmatprep.mubr.msk.bf16.mxu1 %vm149_vm2, %v540_v15 }
  0x1a   :  { %501 = vmatmul.mubr.msk.bf16.gmra.mrb[8].mxu0 %vm149_vm2, %v541_v16  ;;  %517 = vmatmul.mubr.msk.bf16.gmra.mrb[8].mxu1 %vm149_vm2, %v542_v17 }
  0x1b   :  { %504 = vmatprep.mubr.msk.bf16.mxu0 %vm149_vm2, %v543_v18  ;;  %520 = vmatprep.mubr.msk.bf16.mxu1 %vm149_vm2, %v544_v19 }
  0x22   :  { %505 = vmatmul.mubr.msk.bf16.gmra.mrb[12].mxu0 %vm149_vm2, %v545_v20  ;;  %521 = vmatmul.mubr.msk.bf16.gmra.mrb[12].mxu1 %vm149_vm2, %v546_v21 }
  0xdd   :  { %v494_v23 = vpop.f32.mrb[0].mxu0  ;;  %v510_v24 = vpop.f32.mrb[0].mxu1 }
  0xde   :  { %v248_v25 = vadd.f32 %v494_v23, %v641_v22  ;;  %v312_v26 = vadd.f32 %v510_v24, %v641_v22  ;;  %v239_v27 = vpop.f32.mrb[1].mxu0  ;;  %v303_v28 = vpop.f32.mrb[1].mxu1 }
  0xdf   :  { %v240_v29 = vadd.f32 %v641_v22, %v239_v27  ;;  %v304_v30 = vadd.f32 %v641_v22, %v303_v28  ;;  %v495_v31 = vpop.f32.mrb[2].mxu0  ;;  %v511_v32 = vpop.f32.mrb[2].mxu1 }
  0xe0   :  { %v368_v33 = vmax.f32 %v248_v25, 0.0  ;;  %v384_v34 = vmax.f32 %v312_v26, 0.0  ;;  %v251_v35 = vadd.f32 %v495_v31, %v641_v22  ;;  %v315_v36 = vadd.f32 %v511_v32, %v641_v22  ;;  %v242_v37 = vpop.f32.mrb[3].mxu0  ;;  %v306_v38 = vpop.f32.mrb[3].mxu1 }
  0xe1   :  { %v366_v39 = vmax.f32 %v240_v29, 0.0  ;;  %v382_v40 = vmax.f32 %v304_v30, 0.0  ;;  %v243_v41 = vadd.f32 %v641_v22, %v242_v37  ;;  %v307_v42 = vadd.f32 %v641_v22, %v306_v38 }
  0xe2   :  { %401 = vst.msk [vmem:[%s806_s3 + $0x10] sm:$0xff] %vm398_vm3, %v368_v33  ;;  %417 = vst.msk [vmem:[%s806_s3 + $0x90] sm:$0xff] %vm398_vm3, %v384_v34  ;;  %v369_v43 = vmax.f32 %v251_v35, 0.0  ;;  %v385_v44 = vmax.f32 %v315_v36, 0.0 }
  0xe3   :  { %399 = vst.msk [vmem:[%s806_s3] sm:$0xff] %vm398_vm3, %v366_v39  ;;  %415 = vst.msk [vmem:[%s806_s3 + $0x80] sm:$0xff] %vm398_vm3, %v382_v40  ;;  %v367_v45 = vmax.f32 %v243_v41, 0.0  ;;  %v383_v46 = vmax.f32 %v307_v42, 0.0 }
  0xe4   :  { %402 = vst.msk [vmem:[%s806_s3 + $0x18] sm:$0xff] %vm398_vm3, %v369_v43  ;;  %418 = vst.msk [vmem:[%s806_s3 + $0x98] sm:$0xff] %vm398_vm3, %v385_v44 }
  0xe5   :  { %400 = vst.msk [vmem:[%s806_s3 + $0x8] sm:$0xff] %vm398_vm3, %v367_v45  ;;  %416 = vst.msk [vmem:[%s806_s3 + $0x88] sm:$0xff] %vm398_vm3, %v383_v46  ;;  %v498_v47 = vpop.f32.mrb[4].mxu0  ;;  %v514_v48 = vpop.f32.mrb[4].mxu1 }
  0xe6   :  { %v264_v49 = vadd.f32 %v498_v47, %v641_v22  ;;  %v328_v50 = vadd.f32 %v514_v48, %v641_v22  ;;  %v255_v51 = vpop.f32.mrb[5].mxu0  ;;  %v319_v52 = vpop.f32.mrb[5].mxu1 }
  0xe7   :  { %v256_v53 = vadd.f32 %v641_v22, %v255_v51  ;;  %v320_v54 = vadd.f32 %v641_v22, %v319_v52  ;;  %v499_v55 = vpop.f32.mrb[6].mxu0  ;;  %v515_v56 = vpop.f32.mrb[6].mxu1 }
  0xe8   :  { %v372_v57 = vmax.f32 %v264_v49, 0.0  ;;  %v388_v58 = vmax.f32 %v328_v50, 0.0  ;;  %v267_v59 = vadd.f32 %v499_v55, %v641_v22  ;;  %v331_v60 = vadd.f32 %v515_v56, %v641_v22  ;;  %v258_v61 = vpop.f32.mrb[7].mxu0  ;;  %v322_v62 = vpop.f32.mrb[7].mxu1 }
  0xe9   :  { %v370_v63 = vmax.f32 %v256_v53, 0.0  ;;  %v386_v0 = vmax.f32 %v320_v54, 0.0  ;;  %v259_v1 = vadd.f32 %v641_v22, %v258_v61  ;;  %v323_v2 = vadd.f32 %v641_v22, %v322_v62 }
  0xea   :  { %405 = vst.msk [vmem:[%s806_s3 + $0x30] sm:$0xff] %vm398_vm3, %v372_v57  ;;  %421 = vst.msk [vmem:[%s806_s3 + $0xb0] sm:$0xff] %vm398_vm3, %v388_v58  ;;  %v373_v3 = vmax.f32 %v267_v59, 0.0  ;;  %v389_v4 = vmax.f32 %v331_v60, 0.0 }
  0xeb   :  { %403 = vst.msk [vmem:[%s806_s3 + $0x20] sm:$0xff] %vm398_vm3, %v370_v63  ;;  %419 = vst.msk [vmem:[%s806_s3 + $0xa0] sm:$0xff] %vm398_vm3, %v386_v0  ;;  %v371_v5 = vmax.f32 %v259_v1, 0.0  ;;  %v387_v6 = vmax.f32 %v323_v2, 0.0 }
  0xec   :  { %406 = vst.msk [vmem:[%s806_s3 + $0x38] sm:$0xff] %vm398_vm3, %v373_v3  ;;  %422 = vst.msk [vmem:[%s806_s3 + $0xb8] sm:$0xff] %vm398_vm3, %v389_v4 }
  0xed   :  { %404 = vst.msk [vmem:[%s806_s3 + $0x28] sm:$0xff] %vm398_vm3, %v371_v5  ;;  %420 = vst.msk [vmem:[%s806_s3 + $0xa8] sm:$0xff] %vm398_vm3, %v387_v6  ;;  %v502_v7 = vpop.f32.mrb[8].mxu0  ;;  %v518_v8 = vpop.f32.mrb[8].mxu1 }
  0xee   :  { %v280_v9 = vadd.f32 %v502_v7, %v641_v22  ;;  %v344_v10 = vadd.f32 %v518_v8, %v641_v22  ;;  %v271_v11 = vpop.f32.mrb[9].mxu0  ;;  %v335_v12 = vpop.f32.mrb[9].mxu1 }
  0xef   :  { %v272_v13 = vadd.f32 %v641_v22, %v271_v11  ;;  %v336_v14 = vadd.f32 %v641_v22, %v335_v12  ;;  %v503_v15 = vpop.f32.mrb[10].mxu0  ;;  %v519_v16 = vpop.f32.mrb[10].mxu1 }
  0xf0   :  { %v376_v17 = vmax.f32 %v280_v9, 0.0  ;;  %v392_v18 = vmax.f32 %v344_v10, 0.0  ;;  %v283_v19 = vadd.f32 %v503_v15, %v641_v22  ;;  %v347_v20 = vadd.f32 %v519_v16, %v641_v22  ;;  %v274_v21 = vpop.f32.mrb[11].mxu0  ;;  %v338_v23 = vpop.f32.mrb[11].mxu1 }
  0xf1   :  { %v374_v24 = vmax.f32 %v272_v13, 0.0  ;;  %v390_v25 = vmax.f32 %v336_v14, 0.0  ;;  %v275_v26 = vadd.f32 %v641_v22, %v274_v21  ;;  %v339_v27 = vadd.f32 %v641_v22, %v338_v23 }
  0xf2   :  { %409 = vst.msk [vmem:[%s806_s3 + $0x50] sm:$0xff] %vm398_vm3, %v376_v17  ;;  %425 = vst.msk [vmem:[%s806_s3 + $0xd0] sm:$0xff] %vm398_vm3, %v392_v18  ;;  %v377_v28 = vmax.f32 %v283_v19, 0.0  ;;  %v393_v29 = vmax.f32 %v347_v20, 0.0 }
  0xf3   :  { %407 = vst.msk [vmem:[%s806_s3 + $0x40] sm:$0xff] %vm398_vm3, %v374_v24  ;;  %423 = vst.msk [vmem:[%s806_s3 + $0xc0] sm:$0xff] %vm398_vm3, %v390_v25  ;;  %v375_v30 = vmax.f32 %v275_v26, 0.0  ;;  %v391_v31 = vmax.f32 %v339_v27, 0.0 }
  0xf4   :  { %410 = vst.msk [vmem:[%s806_s3 + $0x58] sm:$0xff] %vm398_vm3, %v377_v28  ;;  %426 = vst.msk [vmem:[%s806_s3 + $0xd8] sm:$0xff] %vm398_vm3, %v393_v29 }
  0xf5   :  { %408 = vst.msk [vmem:[%s806_s3 + $0x48] sm:$0xff] %vm398_vm3, %v375_v30  ;;  %424 = vst.msk [vmem:[%s806_s3 + $0xc8] sm:$0xff] %vm398_vm3, %v391_v31  ;;  %v506_v32 = vpop.f32.mrb[12].mxu0  ;;  %v522_v33 = vpop.f32.mrb[12].mxu1 }
  0xf6   :  { %v296_v34 = vadd.f32 %v506_v32, %v641_v22  ;;  %v360_v35 = vadd.f32 %v522_v33, %v641_v22  ;;  %v287_v36 = vpop.f32.mrb[13].mxu0  ;;  %v351_v37 = vpop.f32.mrb[13].mxu1 }
  0xf7   :  { %v288_v38 = vadd.f32 %v641_v22, %v287_v36  ;;  %v352_v39 = vadd.f32 %v641_v22, %v351_v37  ;;  %v507_v40 = vpop.f32.mrb[14].mxu0  ;;  %v523_v41 = vpop.f32.mrb[14].mxu1 }
  0xf8   :  { %v380_v42 = vmax.f32 %v296_v34, 0.0  ;;  %v396_v43 = vmax.f32 %v360_v35, 0.0  ;;  %v299_v44 = vadd.f32 %v507_v40, %v641_v22  ;;  %v363_v45 = vadd.f32 %v523_v41, %v641_v22  ;;  %v290_v46 = vpop.f32.mrb[15].mxu0  ;;  %v354_v47 = vpop.f32.mrb[15].mxu1 }
  0xf9   :  { %v378_v48 = vmax.f32 %v288_v38, 0.0  ;;  %v394_v49 = vmax.f32 %v352_v39, 0.0  ;;  %v291_v50 = vadd.f32 %v641_v22, %v290_v46  ;;  %v355_v51 = vadd.f32 %v641_v22, %v354_v47 }
  0xfa   :  { %413 = vst.msk [vmem:[%s806_s3 + $0x70] sm:$0xff] %vm398_vm3, %v380_v42  ;;  %429 = vst.msk [vmem:[%s806_s3 + $0xf0] sm:$0xff] %vm398_vm3, %v396_v43  ;;  %v381_v52 = vmax.f32 %v299_v44, 0.0  ;;  %v397_v53 = vmax.f32 %v363_v45, 0.0 }
  0xfb   :  { %411 = vst.msk [vmem:[%s806_s3 + $0x60] sm:$0xff] %vm398_vm3, %v378_v48  ;;  %427 = vst.msk [vmem:[%s806_s3 + $0xe0] sm:$0xff] %vm398_vm3, %v394_v49  ;;  %v379_v22 = vmax.f32 %v291_v50, 0.0  ;;  %v395_v54 = vmax.f32 %v355_v51, 0.0 }
  0xfc   :  { %414 = vst.msk [vmem:[%s806_s3 + $0x78] sm:$0xff] %vm398_vm3, %v381_v52  ;;  %430 = vst.msk [vmem:[%s806_s3 + $0xf8] sm:$0xff] %vm398_vm3, %v397_v53 }
  0xfd   :  { %412 = vst.msk [vmem:[%s806_s3 + $0x68] sm:$0xff] %vm398_vm3, %v379_v22  ;;  %428 = vst.msk [vmem:[%s806_s3 + $0xe8] sm:$0xff] %vm398_vm3, %v395_v54 }

// kernel: extract_region_feature_forward.3
= control target key start
LH: loop header
LB: loop body
LE: loop exit
PB: predicated region body
PF: predicated region fallthrough
CT: control target
= control target key end

     0   :  { %s3208_s0 = inlined_call_operand.vmem [shape: bf16[2,64,16], index: 0, kind: input, shape index: {}]   ;;  %s3209_s1 = inlined_call_operand.vmem [shape: bf16[144,64], index: 1, kind: input, shape index: {}]   ;;  %s3210_s2 = inlined_call_operand.vmem [shape: bf16[16,64], index: 2, kind: input, shape index: {}]   ;;  %s3211_s3 = inlined_call_operand.vmem [shape: bf16[16,8], index: 3, kind: input, shape index: {}]   ;;  %s3212_s4 = inlined_call_operand.vmem [shape: f32[1,8], index: 4, kind: input, shape index: {}]   ;;  %s3213_s5 = inlined_call_operand.vmem [shape: bf16[9,8,8], index: 5, kind: input, shape index: {}]   ;;  %s3214_s6 = inlined_call_operand.vmem [shape: f32[1,8], index: 6, kind: input, shape index: {}]   ;;  %s3215_s7 = inlined_call_operand.vmem [shape: bf16[8,32], index: 7, kind: input, shape index: {}]   ;;  %s3216_s8 = inlined_call_operand.vmem [shape: f32[1,32], index: 8, kind: input, shape index: {}]   ;;  %s3217_s9 = inlined_call_operand.vmem [shape: bf16[16,32], index: 9, kind: input, shape index: {}]   ;;  %s3218_s10 = inlined_call_operand.vmem [shape: f32[1,32], index: 10, kind: input, shape index: {}]   ;;  %s3219_s11 = inlined_call_operand.vmem [shape: f32[1,32], index: 11, kind: input, shape index: {}]   ;;  %s3220_s12 = inlined_call_operand.vmem [shape: f32[16,32], index: 12, kind: input, shape index: {}]   ;;  %s3221_s13 = inlined_call_operand.vmem [shape: bf16[32,96], index: 13, kind: input, shape index: {}]   ;;  %s3222_s14 = inlined_call_operand.vmem [shape: f32[1,96], index: 14, kind: input, shape index: {}]   ;;  %s3223_s15 = inlined_call_operand.vmem [shape: f32[32,4], index: 15, kind: input, shape index: {}]   ;;  %s3224_s16 = inlined_call_operand.vmem [shape: f32[4,32], index: 16, kind: input, shape index: {}]   ;;  %s3225_s17 = inlined_call_operand.vmem [shape: bf16[32,128], index: 17, kind: input, shape index: {}]   ;;  %s3226_s18 = inlined_call_operand.vmem [shape: f32[1,128], index: 18, kind: input, shape index: {}]   ;;  %s3227_s19 = inlined_call_operand.hbm [shape: f32[2,1,128], index: 19, kind: output, shape index: {}]  }
   0x1   :  { %3232 = sst [smem:[#allocation8_spill]] %s3208_s0 }
   0x2   :  { %3233 = sst [smem:[#allocation9_spill]] %s3209_s1 }
   0x3   :  { %3234 = sst [smem:[#allocation10_spill]] %s3210_s2 }
   0x4   :  { %3235 = sst [smem:[#allocation11_spill]] %s3211_s3 }
   0x5   :  { %3236 = sst [smem:[#allocation12_spill]] %s3212_s4 }
   0x6   :  { %3237 = sst [smem:[#allocation13_spill]] %s3213_s5 }
   0x7   :  { %24 = vsyncpa [#allocation3], 0 }
   0x8   :  { %26 = vsyncpa [#allocation3 + $0x1], 0  ;;  %s2841_s0 = smov 0   ;;  %s2843_s30 = smov 0  }
   0x9   :  { %s2845_s20 = smov 0   ;;  %s2847_s21 = smov 0  }
   0xa LB: > { %3238 = sst [smem:[#allocation5_spill]] %s2729_s20  ;;  %s2862_s1 = sadd.s32 4294967295, %s2733_s21   ;;  %s2733_s21 = sphi %s2847_s21, %s3249_s21   ;;  %s2729_s20 = sphi %s2845_s20, %s3251_s20   ;;  %s2725_s30 = sphi %s2843_s30, %s3253_s30   ;;  %s2721_s0 = sphi %s2841_s0, %s3252_s0  }
   0xb   : > { %s2241_s22 = sadd.s32 4294967294, %s2733_s21   ;;  %s2866_s2 = sadd.s32 1, %s2733_s21  }
   0xc   : > { %3239 = sst [smem:[#allocation6_spill]] %s2866_s2  ;;  %s443_s23 = sadd.s32 1, %s2729_s20 }
   0xd   : > { %s440_s24 = ssub.s32 %s2733_s21, %s2866_s2  ;;  %p453_p0 = scmp.ne.s32.totalorder %s2729_s20, %s2725_s30 }
   0xe   : > { %p441_p1 = scmp.eq.s32.totalorder %s440_s24, 0  ;;  %p454_p2 = scmp.eq.s32.totalorder %s2862_s1, 1 }
   0xf   : > { %p459_p3 = scmp.ne.s32.totalorder %s2725_s30, %s2721_s0  ;;  %p460_p4 = scmp.eq.s32.totalorder %s2241_s22, 1 }
  0x10   : > { %s2877_s25 = scalar_select %p441_p1, %s2729_s20, %s443_s23  }
  0x11   : > { %p2879_p5 = por %p454_p2, %p453_p0  ;;  %p2883_p6 = por %p460_p4, %p459_p3 }
  0x12   : > { %3240 = sst [smem:[#allocation7_spill]] %s2877_s25  ;;  %p2244_p7 = scmp.ge.s32.totalorder %s2733_s21, 1 }
  0x13   : > { %p540_p8 = scmp.lt.s32.totalorder %s2733_s21, 3 }
  0x15   : > { %p541_p9 = pnand %p2244_p7, %p540_p8 }
  0x16   : > { %s3243_s29 = sld [smem:[#allocation11_spill]] (!%p541_p9)  ;;  %p595_p10 = scmp.lt.s32.totalorder (!%p541_p9), %s2862_s1, 1  ;;  %vm644_vm0 = vcmask (!%p541_p9), 130048   ;;  %v2735_v5 = vmov (!%p541_p9), 0.0   ;;  %vm2736_vm1 = vmmov (!%p541_p9), 0   ;;  %vm939_vm2 = vcmask (!%p541_p9), 1043456  }
  0x17   : > { %544 = sbr.rel (%p541_p9) target bundleno = 2108 (0x83c), region = 96  ;;  %s3244_s20 = sld [smem:[#allocation8_spill]] (!%p541_p9)  ;;  %2399 = vmatprep.subr.bf16.mxu1 (!%p541_p9), %v2735_v5  ;;  %2407 = vmatprep.mubr.msk.bf16.mxu1 (!%p541_p9), %vm2736_vm1, %v2735_v5  ;;  %vm797_vm3 = vcmask (!%p541_p9), 523264   ;;  %vm935_vm4 = vcmask (!%p541_p9), 64512   ;;  %vm1581_vm5 = vcmask (!%p541_p9), 261120   ;;  %vm1890_vm6 = vcmask (!%p541_p9), 31744  }
  0x18   : > { %s3245_s5 = sld [smem:[#allocation13_spill]] (!%p541_p9)  ;;  %s3246_s4 = sld [smem:[#allocation12_spill]] (!%p541_p9) }
  0x19   : > { %s2738_s24 = smov (!%p541_p9), 96   ;;  %s2740_s25 = smov (!%p541_p9), [#allocation2]  }
  0x1c   : > { %v2643_v0 = vld [vmem:[%s3243_s29] sm:$0xff] (!%p541_p9)  }
  0x1d   : > { %2389 = vmatprep.subr.bf16.mxu0 (!%p541_p9), %v2643_v0 }
  0x1e   : > { %s596_s22 = scalar_select %p595_p10, %s2862_s1, 1  ;;  %2390 = vmatpush3.bf16.msra.mxu0 %v2643_v0  ;;  %v2275_v6 = vld [vmem:[%s3245_s5 + $0x4] sm:$0xf]  ;;  %v2247_v8 = vld [vmem:[%s3246_s4] ss:$0 sm:$0xff] }
  0x1f   : > { %2443 = vmatprep.subr.bf16.mxu0 %v2735_v5  ;;  %v941_v7 = vsel %vm939_vm2, %v2275_v6, 0  ;;  %v931_v53 = vld [vmem:[%s3245_s5] sm:$0xf]  ;;  %v2278_v60 = vld [vmem:[%s3245_s5 + $0x8] sm:$0xf] }
  0x20   : > { %s2318_s23 = sshll.u32 %s596_s22, 5  ;;  %s3247_s22 = sld [smem:[#allocation9_spill]]  ;;  %v988_v58 = vsel %vm939_vm2, %v931_v53, 0  ;;  %v1038_v63 = vsel %vm939_vm2, %v2278_v60, 0 }
  0x21   : > { %s599_s2 = scalar_lea.vmem %s3244_s20, %s2318_s23  ;;  %s3248_s20 = sld [smem:[#allocation10_spill]] }
  0x22   : > { %v2644_v1 = vld [vmem:[%s599_s2] sm:$0xff]   ;;  %v2645_v2 = vld [vmem:[%s599_s2 + $0x8] sm:$0xff]   ;;  %v2898_v3 = vld [vmem:[%s599_s2 + $0x10] sm:$0xff]  }
  0x23   : > { %2391 = vmatprep.mubr.msk.bf16.mxu0 %vm644_vm0, %v2644_v1  ;;  %v2903_v4 = vld [vmem:[%s599_s2 + $0x18] sm:$0xff]   ;;  %s2315_s2 = sshll.u32 %s2862_s1, 4 }
  0x24   : > { %2392 = vmatmul.mubr.msk.bf16.vlgmr.msra.gmra.mrb[0].mxu0 %vm644_vm0, %v2645_v2  ;;  %s3166_s4 = scalar_lea.hbm %s3227_s19, %s2315_s2 }
  0x25   : > { %2395 = vmatprep.mubr.msk.bf16.mxu0 %vm644_vm0, %v2898_v3  ;;  %2444 = vmatpush3.bf16.msra.mxu0 %v941_v7 }
  0x26   : > { %2449 = vmatprep.subr.bf16.mxu0 %v2735_v5  ;;  %v2648_v37 = vld [vmem:[%s3247_s22] sm:$0xff]   ;;  %v2649_v38 = vld [vmem:[%s3247_s22 + $0x8] sm:$0xff]   ;;  %v2650_v39 = vld [vmem:[%s3247_s22 + $0x10] sm:$0xff]  }
  0x27   : > { %v2651_v40 = vld [vmem:[%s3247_s22 + $0x18] sm:$0xff]   ;;  %v2652_v41 = vld [vmem:[%s3247_s22 + $0x20] sm:$0xff]   ;;  %v2653_v42 = vld [vmem:[%s3247_s22 + $0x28] sm:$0xff]  }
  0x28   : > { %v2654_v43 = vld [vmem:[%s3247_s22 + $0x30] sm:$0xff]   ;;  %v2655_v44 = vld [vmem:[%s3247_s22 + $0x38] sm:$0xff]   ;;  %v2656_v45 = vld [vmem:[%s3247_s22 + $0x40] sm:$0xff]  }
  0x29   : > { %v2657_v46 = vld [vmem:[%s3248_s20] sm:$0xff]   ;;  %s2739_s20 = smov 64  }
  0x2c   : > { %2396 = vmatmul.mubr.msk.bf16.gmra.mrb[4].mxu0 %vm644_vm0, %v2903_v4 }
  0x2d   : > { %2445 = vmatprep.mubr.msk.bf16.mxu0 %vm2736_vm1, %v2735_v5 }
  0xf7   : > { %v2393_v9 = vpop.f32.mrb[0].mxu0 }
  0xf8   : > { %v700_v10 = vadd.f32 %v2393_v9, %v2247_v8  ;;  %v691_v11 = vpop.f32.mrb[1].mxu0 }
  0xf9   : > { %v692_v12 = vadd.f32 %v2247_v8, %v691_v11  ;;  %v2394_v13 = vpop.f32.mrb[2].mxu0  ;;  %v2282_v11 = vld [vmem:[%s3245_s5 + $0x10] sm:$0xf] }
  0xfa   : > { %v703_v14 = vadd.f32 %v2394_v13, %v2247_v8  ;;  %v694_v15 = vpop.f32.mrb[3].mxu0  ;;  %v724_v17 = vmax.f32 %v700_v10, 0.0 }
  0xfb   : > { %v695_v16 = vadd.f32 %v2247_v8, %v694_v15  ;;  %v722_v19 = vmax.f32 %v692_v12, 0.0 }
  0xfc   : > { %v725_v18 = vmax.f32 %v703_v14, 0.0  ;;  %v1142_v14 = vsel %vm939_vm2, %v2282_v11, 0 }
  0xfd   : > { %v723_v20 = vmax.f32 %v695_v16, 0.0 }
  0xfe   : > { %v731_v21 = vpack.c.bf16 %v725_v18, %v724_v17  ;;  %v2284_v18 = vld [vmem:[%s3245_s5 + $0x14] sm:$0xf] }
  0xff   : > { %v2397_v22 = vpop.f32.mrb[4].mxu0  ;;  %v730_v23 = vpack.c.bf16 %v723_v20, %v722_v19 }
 0x100   : > { %v716_v24 = vadd.f32 %v2397_v22, %v2247_v8  ;;  %v707_v25 = vpop.f32.mrb[5].mxu0 }
 0x101   : > { %v708_v26 = vadd.f32 %v2247_v8, %v707_v25  ;;  %v2398_v27 = vpop.f32.mrb[6].mxu0  ;;  %2400 = vmatpush3.bf16.msra.mxu1 %v730_v23  ;;  %v2286_v25 = vld [vmem:[%s3245_s5 + $0x18] sm:$0xf] }
 0x102   : > { %v719_v28 = vadd.f32 %v2398_v27, %v2247_v8  ;;  %v710_v29 = vpop.f32.mrb[7].mxu0  ;;  %2401 = vmatprep.subr.bf16.mxu1 %v2735_v5  ;;  %v728_v31 = vmax.f32 %v716_v24, 0.0 }
 0x103   : > { %v711_v30 = vadd.f32 %v2247_v8, %v710_v29  ;;  %v726_v33 = vmax.f32 %v708_v26, 0.0 }
 0x104   : > { %v729_v32 = vmax.f32 %v719_v28, 0.0  ;;  %v1246_v28 = vsel %vm939_vm2, %v2286_v25, 0 }
 0x105   : > { %v727_v34 = vmax.f32 %v711_v30, 0.0  ;;  %2402 = vmatpush3.bf16.msra.mxu1 %v731_v21  ;;  %v1194_v21 = vsel %vm939_vm2, %v2284_v18, 0 }
 0x106   : > { %v733_v35 = vpack.c.bf16 %v729_v32, %v728_v31  ;;  %2403 = vmatprep.subr.bf16.mxu1 %v2735_v5  ;;  %v2288_v32 = vld [vmem:[%s3245_s5 + $0x1c] sm:$0xf] }
 0x107   : > { %v732_v36 = vpack.c.bf16 %v727_v34, %v726_v33 }
 0x109   : > { %2404 = vmatpush3.bf16.msra.mxu1 %v732_v36 }
 0x10a   : > { %2405 = vmatprep.subr.bf16.mxu1 %v2735_v5 }
 0x10d   : > { %2406 = vmatpush3.bf16.msra.mxu1 %v733_v35  ;;  %v1298_v35 = vsel %vm939_vm2, %v2288_v32, 0 }
 0x10e   : > { %2497 = vmatprep.subr.bf16.mxu1 %v2735_v5 }
 0x110   : > { %2408 = vmatmul.mubr.msk.bf16.vlgmr.msra.gmra.mrb[0].mxu1 %vm797_vm3, %v2648_v37 }
 0x111   : > { %2411 = vmatprep.mubr.msk.bf16.mxu1 %vm2736_vm1, %v2735_v5  ;;  %2498 = vmatpush3.bf16.msra.mxu1 %v2644_v1 }
 0x112   : > { %2499 = vmatprep.subr.bf16.mxu1 %v2735_v5 }
 0x115   : > { %2500 = vmatpush3.bf16.msra.mxu1 %v2645_v2 }
 0x116   : > { %2501 = vmatprep.subr.bf16.mxu1 %v2735_v5 }
 0x118   : > { %2412 = vmatmul.mubr.msk.bf16.gmra.mrb[4].mxu1 %vm797_vm3, %v2649_v38 }
 0x119   : > { %2415 = vmatprep.mubr.msk.bf16.mxu1 %vm2736_vm1, %v2735_v5  ;;  %2502 = vmatpush3.bf16.msra.mxu1 %v2898_v3  ;;  %v2280_v3 = vld [vmem:[%s3245_s5 + $0xc] sm:$0xf] }
 0x11a   : > { %2503 = vmatprep.subr.bf16.mxu1 %v2735_v5  ;;  %v1090_v7 = vsel %vm939_vm2, %v2280_v3, 0 }
 0x11d   : > { %2504 = vmatpush3.bf16.msra.mxu1 %v2903_v4 }
 0x11e   : > { %2521 = vmatprep.subr.bf16.mxu1 %v2735_v5 }
 0x120   : > { %2416 = vmatmul.mubr.msk.bf16.gmra.mrb[8].mxu1 %vm797_vm3, %v2650_v39  ;;  %v2290_v39 = vld [vmem:[%s3245_s5 + $0x20] sm:$0xf]  ;;  %s2675_s5 = sshll.u32 %s2740_s25, 4  ;;  %s2676_s5 = int_to_ptr.vmem [resolvable:$false] %s2675_s5 }
 0x121   : > { %2419 = vmatprep.mubr.msk.bf16.mxu1 %vm2736_vm1, %v2735_v5  ;;  %s2677_s29 = scalar_lea.vmem %s2676_s5, 32 }
 0x128   : > { %2420 = vmatmul.mubr.msk.bf16.gmra.mrb[12].mxu1 %vm797_vm3, %v2651_v40 }
 0x129   : > { %2423 = vmatprep.mubr.msk.bf16.mxu1 %vm2736_vm1, %v2735_v5 }
 0x130   : > { %2424 = vmatmul.mubr.msk.bf16.gmra.mrb[16].mxu1 %vm797_vm3, %v2652_v41 }
 0x131   : > { %2427 = vmatprep.mubr.msk.bf16.mxu1 %vm2736_vm1, %v2735_v5 }
 0x138   : > { %2428 = vmatmul.mubr.msk.bf16.gmra.mrb[20].mxu1 %vm797_vm3, %v2653_v42  ;;  %v1350_v42 = vsel %vm939_vm2, %v2290_v39, 0 }
 0x139   : > { %2431 = vmatprep.mubr.msk.bf16.mxu1 %vm2736_vm1, %v2735_v5 }
 0x140   : > { %2432 = vmatmul.mubr.msk.bf16.gmra.mrb[24].mxu1 %vm797_vm3, %v2654_v43 }
 0x141   : > { %2435 = vmatprep.mubr.msk.bf16.mxu1 %vm2736_vm1, %v2735_v5 }
 0x148   : > { %2436 = vmatmul.mubr.msk.bf16.gmra.mrb[28].mxu1 %vm797_vm3, %v2655_v44 }
 0x149   : > { %2439 = vmatprep.mubr.msk.bf16.mxu1 %vm2736_vm1, %v2735_v5 }
 0x150   : > { %2440 = vmatmul.mubr.msk.bf16.gmra.mrb[32].mxu1 %vm797_vm3, %v2656_v45  ;;  %v2658_v45 = vld [vmem:[%s3217_s9] sm:$0xff]  }
 0x151   : > { %2505 = vmatprep.mubr.msk.bf16.mxu1 %vm2736_vm1, %v2735_v5 }
 0x158   : > { %2506 = vmatmul.mubr.msk.bf16.vlgmr.msra.gmra.mrb[36].mxu1 %vm797_vm3, %v2657_v46 }
 0x159   : > { %2525 = vmatprep.mubr.msk.bf16.mxu1 %vm2736_vm1, %v2735_v5 }
 0x1e3   : > { %v859_v47 = vpop.f32.mrb[0].mxu1 }
 0x1e4   : > { %v2409_v48 = vpop.f32.mrb[1].mxu1 }
 0x1e5   : > { %v862_v49 = vpop.f32.mrb[2].mxu1 }
 0x1e6   : > { %v930_v50 = vpack.c.bf16 %v862_v49, %v859_v47  ;;  %v2410_v51 = vpop.f32.mrb[3].mxu1 }
 0x1e7   : > { %v1522_v51 = vld [vmem:[%s3215_s7] sm:$0xf] }
 0x1eb   : > { %v867_v52 = vpop.f32.mrb[4].mxu1 }
 0x1ec   : > { %v2413_v54 = vpop.f32.mrb[5].mxu1 }
 0x1ed   : > { %v870_v55 = vpop.f32.mrb[6].mxu1 }
 0x1ee   : > { %v932_v56 = vpack.c.bf16 %v870_v55, %v867_v52  ;;  %v2414_v57 = vpop.f32.mrb[7].mxu1  ;;  %v1534_v52 = vsel %vm939_vm2, %v1522_v51, 0  ;;  %v2298_v51 = vld [vmem:[%s3216_s8] ss:$0 sm:$0xff] }
 0x1f0   : > { %2446 = vmatmul.mubr.msk.bf16.vlgmr.msra.gmra.mrb[8].mxu0 %vm935_vm4, %v932_v56 }
 0x1f1   : > { %2450 = vmatpush3.bf16.msra.mxu0 %v988_v58  ;;  %2451 = vmatprep.mubr.msk.bf16.mxu0 %vm2736_vm1, %v2735_v5 }
 0x1f2   : > { %2455 = vmatprep.subr.bf16.mxu0 %v2735_v5 }
 0x1f3   : > { %v875_v59 = vpop.f32.mrb[8].mxu1 }
 0x1f4   : > { %v2417_v61 = vpop.f32.mrb[9].mxu1 }
 0x1f5   : > { %v878_v62 = vpop.f32.mrb[10].mxu1 }
 0x1f6   : > { %v1031_v0 = vpack.c.bf16 %v878_v62, %v875_v59  ;;  %v2418_v1 = vpop.f32.mrb[11].mxu1 }
 0x1f8   : > { %2452 = vmatmul.mubr.msk.bf16.vlgmr.msra.gmra.mrb[12].mxu0 %vm935_vm4, %v930_v50 }
 0x1f9   : > { %2456 = vmatpush3.bf16.msra.mxu0 %v1038_v63  ;;  %2457 = vmatprep.mubr.msk.bf16.mxu0 %vm2736_vm1, %v2735_v5 }
 0x1fa   : > { %2461 = vmatprep.subr.bf16.mxu0 %v2735_v5 }
 0x1fb   : > { %v883_v2 = vpop.f32.mrb[12].mxu1 }
 0x1fc   : > { %v2421_v4 = vpop.f32.mrb[13].mxu1 }
 0x1fd   : > { %v886_v6 = vpop.f32.mrb[14].mxu1 }
 0x1fe   : > { %v1083_v8 = vpack.c.bf16 %v886_v6, %v883_v2  ;;  %v2422_v9 = vpop.f32.mrb[15].mxu1 }
 0x200   : > { %2458 = vmatmul.mubr.msk.bf16.vlgmr.msra.gmra.mrb[16].mxu0 %vm935_vm4, %v1031_v0 }
 0x201   : > { %2462 = vmatpush3.bf16.msra.mxu0 %v1090_v7  ;;  %2463 = vmatprep.mubr.msk.bf16.mxu0 %vm2736_vm1, %v2735_v5 }
 0x202   : > { %2467 = vmatprep.subr.bf16.mxu0 %v2735_v5 }
 0x203   : > { %v891_v10 = vpop.f32.mrb[16].mxu1 }
 0x204   : > { %v2425_v12 = vpop.f32.mrb[17].mxu1 }
 0x205   : > { %v894_v13 = vpop.f32.mrb[18].mxu1 }
 0x206   : > { %v1135_v15 = vpack.c.bf16 %v894_v13, %v891_v10  ;;  %v2426_v16 = vpop.f32.mrb[19].mxu1 }
 0x208   : > { %2464 = vmatmul.mubr.msk.bf16.vlgmr.msra.gmra.mrb[20].mxu0 %vm935_vm4, %v1083_v8 }
 0x209   : > { %2468 = vmatpush3.bf16.msra.mxu0 %v1142_v14  ;;  %2469 = vmatprep.mubr.msk.bf16.mxu0 %vm2736_vm1, %v2735_v5 }
 0x20a   : > { %2473 = vmatprep.subr.bf16.mxu0 %v2735_v5 }
 0x20b   : > { %v899_v17 = vpop.f32.mrb[20].mxu1 }
 0x20c   : > { %v2429_v19 = vpop.f32.mrb[21].mxu1 }
 0x20d   : > { %v902_v20 = vpop.f32.mrb[22].mxu1 }
 0x20e   : > { %v1187_v22 = vpack.c.bf16 %v902_v20, %v899_v17  ;;  %v2430_v23 = vpop.f32.mrb[23].mxu1 }
 0x210   : > { %2470 = vmatmul.mubr.msk.bf16.vlgmr.msra.gmra.mrb[24].mxu0 %vm935_vm4, %v1135_v15 }
 0x211   : > { %2474 = vmatpush3.bf16.msra.mxu0 %v1194_v21  ;;  %2475 = vmatprep.mubr.msk.bf16.mxu0 %vm2736_vm1, %v2735_v5 }
 0x212   : > { %2479 = vmatprep.subr.bf16.mxu0 %v2735_v5 }
 0x213   : > { %v907_v24 = vpop.f32.mrb[24].mxu1 }
 0x214   : > { %v2433_v26 = vpop.f32.mrb[25].mxu1 }
 0x215   : > { %v910_v27 = vpop.f32.mrb[26].mxu1 }
 0x216   : > { %v1239_v29 = vpack.c.bf16 %v910_v27, %v907_v24  ;;  %v2434_v30 = vpop.f32.mrb[27].mxu1 }
 0x218   : > { %2476 = vmatmul.mubr.msk.bf16.vlgmr.msra.gmra.mrb[28].mxu0 %vm935_vm4, %v1187_v22 }
 0x219   : > { %2480 = vmatpush3.bf16.msra.mxu0 %v1246_v28  ;;  %2481 = vmatprep.mubr.msk.bf16.mxu0 %vm2736_vm1, %v2735_v5 }
 0x21a   : > { %2485 = vmatprep.subr.bf16.mxu0 %v2735_v5 }
 0x21b   : > { %v915_v31 = vpop.f32.mrb[28].mxu1 }
 0x21c   : > { %v2437_v33 = vpop.f32.mrb[29].mxu1 }
 0x21d   : > { %v918_v34 = vpop.f32.mrb[30].mxu1 }
 0x21e   : > { %v1291_v36 = vpack.c.bf16 %v918_v34, %v915_v31  ;;  %v2438_v37 = vpop.f32.mrb[31].mxu1 }
 0x21f   : > { %v2292_v37 = vld [vmem:[%s3214_s6] ss:$0 sm:$0xff] }
 0x220   : > { %2482 = vmatmul.mubr.msk.bf16.vlgmr.msra.gmra.mrb[32].mxu0 %vm935_vm4, %v1239_v29 }
 0x221   : > { %2486 = vmatpush3.bf16.msra.mxu0 %v1298_v35  ;;  %2487 = vmatprep.mubr.msk.bf16.mxu0 %vm2736_vm1, %v2735_v5 }
 0x222   : > { %2491 = vmatprep.subr.bf16.mxu0 %v2735_v5 }
 0x223   : > { %v923_v38 = vpop.f32.mrb[32].mxu1 }
 0x224   : > { %v2441_v40 = vpop.f32.mrb[33].mxu1 }
 0x225   : > { %v926_v41 = vpop.f32.mrb[34].mxu1 }
 0x226   : > { %v1343_v43 = vpack.c.bf16 %v926_v41, %v923_v38  ;;  %v2442_v44 = vpop.f32.mrb[35].mxu1 }
 0x228   : > { %2488 = vmatmul.mubr.msk.bf16.vlgmr.msra.gmra.mrb[36].mxu0 %vm935_vm4, %v1291_v36 }
 0x229   : > { %2492 = vmatpush3.bf16.msra.mxu0 %v1350_v42  ;;  %2493 = vmatprep.mubr.msk.bf16.mxu0 %vm2736_vm1, %v2735_v5 }
 0x22a   : > { %2509 = vmatprep.subr.bf16.mxu0 %v2735_v5 }
 0x22b   : > { %v1455_v46 = vpop.f32.mrb[36].mxu1 }
 0x22c   : > { %v2507_v47 = vpop.f32.mrb[37].mxu1 }
 0x22d   : > { %v1458_v48 = vpop.f32.mrb[38].mxu1 }
 0x22e   : > { %v1462_v49 = vpack.c.bf16 %v1458_v48, %v1455_v46  ;;  %v2508_v50 = vpop.f32.mrb[39].mxu1  ;;  %v2659_v48 = vld [vmem:[%s3221_s13] sm:$0xff]  }
 0x22f   : > { %2522 = vmatpush3.bf16.msra.mxu1 %v2659_v48  ;;  %v2295_v50 = vld [vmem:[%s3218_s10] ss:$0 sm:$0xff] }
 0x230   : > { %2494 = vmatmul.mubr.msk.bf16.vlgmr.msra.gmra.mrb[40].mxu0 %vm935_vm4, %v1343_v43  ;;  %2523 = vmatprep.subr.bf16.mxu1 %v2735_v5 }
 0x231   : > { %2511 = vmatprep.mubr.msk.bf16.mxu0 %vm2736_vm1, %v2735_v5  ;;  %2510 = vmatpush3.bf16.msra.mxu0 %v2658_v45 }
 0x232   : > { %2515 = vmatprep.subr.bf16.mxu0 %v2735_v5 }
 0x238   : > { %2512 = vmatmul.mubr.msk.bf16.vlgmr.msra.gmra.mrb[44].mxu0 %vm644_vm0, %v1462_v49  ;;  %v2660_v49 = vld [vmem:[%s3221_s13 + $0x8] sm:$0xff]  }
 0x239   : > { %2516 = vmatpush3.bf16.msra.mxu0 %v1534_v52  ;;  %2517 = vmatprep.mubr.msk.bf16.mxu0 %vm2736_vm1, %v2735_v5  ;;  %v2591_v52 = vadd.f32 %v2298_v51, %v2295_v50 }
 0x23a   : > { %2524 = vmatpush3.bf16.msra.mxu1 %v2660_v49 }
 0x23b   : > { %2529 = vmatprep.subr.bf16.mxu1 %v2735_v5 }
 0x2c3   : > { %v977_v53 = vpop.f32.mrb[8].mxu0 }
 0x2c4   : > { %v2447_v54 = vpop.f32.mrb[9].mxu0 }
 0x2c5   : > { %v980_v55 = vpop.f32.mrb[10].mxu0 }
 0x2c6   : > { %v2448_v56 = vpop.f32.mrb[11].mxu0 }
 0x2cb   : > { %v1024_v57 = vpop.f32.mrb[12].mxu0 }
 0x2cc   : > { %v1025_v58 = vadd.f32 %v1024_v57, %v977_v53  ;;  %v2453_v59 = vpop.f32.mrb[13].mxu0 }
 0x2cd   : > { %v1027_v60 = vpop.f32.mrb[14].mxu0 }
 0x2ce   : > { %v1028_v61 = vadd.f32 %v1027_v60, %v980_v55  ;;  %v2454_v62 = vpop.f32.mrb[15].mxu0  ;;  %v1595_v60 = vld [vmem:[%s3220_s12] sm:$0xff] }
 0x2d3   : > { %v1074_v63 = vpop.f32.mrb[16].mxu0 }
 0x2d4   : > { %v1081_v0 = vadd.f32 %v1074_v63, %v1025_v58  ;;  %v2459_v1 = vpop.f32.mrb[17].mxu0 }
 0x2d5   : > { %v1077_v2 = vpop.f32.mrb[18].mxu0 }
 0x2d6   : > { %v1082_v3 = vadd.f32 %v1077_v2, %v1028_v61  ;;  %v2460_v4 = vpop.f32.mrb[19].mxu0  ;;  %v1596_v61 = vld [vmem:[%s3220_s12 + $0x8] sm:$0xff] }
 0x2db   : > { %v1126_v6 = vpop.f32.mrb[20].mxu0 }
 0x2dc   : > { %v1133_v7 = vadd.f32 %v1126_v6, %v1081_v0  ;;  %v2465_v8 = vpop.f32.mrb[21].mxu0 }
 0x2dd   : > { %v1129_v9 = vpop.f32.mrb[22].mxu0 }
 0x2de   : > { %v1134_v10 = vadd.f32 %v1129_v9, %v1082_v3  ;;  %v2466_v11 = vpop.f32.mrb[23].mxu0 }
 0x2e3   : > { %v1178_v12 = vpop.f32.mrb[24].mxu0 }
 0x2e4   : > { %v1185_v13 = vadd.f32 %v1178_v12, %v1133_v7  ;;  %v2471_v14 = vpop.f32.mrb[25].mxu0  ;;  %v1593_v12 = vld [vmem:[%s3219_s11] sm:$0x1] }
 0x2e5   : > { %v1181_v15 = vpop.f32.mrb[26].mxu0 }
 0x2e6   : > { %v1186_v16 = vadd.f32 %v1181_v15, %v1134_v10  ;;  %v2472_v17 = vpop.f32.mrb[27].mxu0 }
 0x2e7   : > { %v1713_v17 = vld [vmem:[%s3223_s15 + $0x8] sm:$0xff] }
 0x2eb   : > { %v1230_v18 = vpop.f32.mrb[28].mxu0 }
 0x2ec   : > { %v1237_v19 = vadd.f32 %v1230_v18, %v1185_v13  ;;  %v2477_v20 = vpop.f32.mrb[29].mxu0  ;;  %v1714_v18 = vld [vmem:[%s3223_s15 + $0x10] sm:$0xff] }
 0x2ed   : > { %v1233_v21 = vpop.f32.mrb[30].mxu0 }
 0x2ee   : > { %v1238_v22 = vadd.f32 %v1233_v21, %v1186_v16  ;;  %v2478_v23 = vpop.f32.mrb[31].mxu0  ;;  %v1712_v16 = vld [vmem:[%s3223_s15] sm:$0xff]  ;;  %v1715_v21 = vld [vmem:[%s3223_s15 + $0x18] sm:$0xff] }
 0x2ef   : > { %v2578_v20 = vpack.c.bf16 %v1713_v17, %v1712_v16  ;;  %v1662_v23 = vlaneseq }
 0x2f3   : > { %v1282_v24 = vpop.f32.mrb[32].mxu0 }
 0x2f4   : > { %v1289_v25 = vadd.f32 %v1282_v24, %v1237_v19  ;;  %v2483_v26 = vpop.f32.mrb[33].mxu0  ;;  %v2737_v19 = vmov 0.0|0.0   ;;  %v1604_v24 = vld [vmem:[%s3222_s14] sm:$0x1] }
 0x2f5   : > { %v1285_v27 = vpop.f32.mrb[34].mxu0  ;;  %2577 = vmatprep.subr.bf16.mxu0 %v2737_v19 }
 0x2f6   : > { %v1290_v28 = vadd.f32 %v1285_v27, %v1238_v22  ;;  %v2484_v29 = vpop.f32.mrb[35].mxu0  ;;  %v2581_v22 = vpack.c.bf16 %v1715_v21, %v1714_v18 }
 0x2fb   : > { %v1334_v30 = vpop.f32.mrb[36].mxu0 }
 0x2fc   : > { %v1341_v31 = vadd.f32 %v1334_v30, %v1289_v25  ;;  %v2489_v32 = vpop.f32.mrb[37].mxu0  ;;  %v1663_v25 = vshrl.u32 %v1662_v23, 7 }
 0x2fd   : > { %v1337_v33 = vpop.f32.mrb[38].mxu0 }
 0x2fe   : > { %v1342_v34 = vadd.f32 %v1337_v33, %v1290_v28  ;;  %v2490_v35 = vpop.f32.mrb[39].mxu0 }
 0x303   : > { %v1386_v36 = vpop.f32.mrb[40].mxu0 }
 0x304   : > { %v1393_v38 = vadd.f32 %v1386_v36, %v1341_v31  ;;  %v2495_v39 = vpop.f32.mrb[41].mxu0  ;;  %v3122_v31 = vsub.s32 0, %v1663_v25  ;;  %v2662_v25 = vld [vmem:[%s3225_s17 + $0x8] sm:$0xff]  }
 0x305   : > { %v1389_v40 = vpop.f32.mrb[42].mxu0 }
 0x306   : > { %v1402_v41 = vadd.f32 %v2292_v37, %v1393_v38  ;;  %v1394_v42 = vadd.f32 %v1389_v40, %v1342_v34  ;;  %v2496_v43 = vpop.f32.mrb[43].mxu0  ;;  %v1665_v32 = vrot.slane %v1604_v24, %v3122_v31 }
 0x308   : > { %v1403_v44 = vadd.f32 %v2292_v37, %v1394_v42  ;;  %v1404_v45 = vmax.f32 %v1402_v41, 0.0 }
 0x30a   : > { %v1405_v46 = vmax.f32 %v1403_v44, 0.0 }
 0x30c   : > { %v1406_v47 = vpack.c.bf16 %v1405_v46, %v1404_v45 }
 0x30e   : > { %2518 = vmatmul.mubr.msk.bf16.vlgmr.msra.gmra.mrb[44].mxu0 %vm935_vm4, %v1406_v47  ;;  %v1716_v47 = vld [vmem:[%s3224_s16] sm:$0xf] }
 0x30f   : > { %2545 = vmatprep.mubr.msk.f32.mxu0 %vm2736_vm1, %v2735_v5  ;;  %2579 = vmatpush3.bf16.msra.mxu0 %v2578_v20 }
 0x310   : > { %2580 = vmatprep.subr.bf16.mxu0 %v2737_v19 }
 0x313   : > { %2582 = vmatpush3.bf16.msra.mxu0 %v2581_v22 }
 0x314   : > { %2559 = vmatprep.subr.mxu0 %v2735_v5 }
 0x3e1   : > { %v1570_v53 = vpop.f32.mrb[44].mxu0 }
 0x3e2   : > { %v2592_v54 = vadd.f32 %v2591_v52, %v1570_v53  ;;  %v2519_v55 = vpop.f32.mrb[45].mxu0 }
 0x3e3   : > { %v1573_v56 = vpop.f32.mrb[46].mxu0 }
 0x3e4   : > { %v1579_v57 = vmax.f32 %v2592_v54, 0.0  ;;  %v2594_v58 = vadd.f32 %v2591_v52, %v1573_v56  ;;  %v2520_v59 = vpop.f32.mrb[47].mxu0 }
 0x3e6   : > { %v1580_v62 = vmax.f32 %v2594_v58, 0.0  ;;  %v1582_v63 = vsel %vm1581_vm5, %v1579_v57, 0.0  ;;  %v1597_v0 = vadd.f32 %v1595_v60, %v1579_v57 }
 0x3e8   : > { %v1583_v1 = vsel %vm1581_vm5, %v1580_v62, 0.0  ;;  %v1598_v2 = vadd.f32 %v1596_v61, %v1580_v62 }
 0x3e9   : > { %v1584_v3 = vadd.f32 %v1583_v1, %v1582_v63 }
 0x3ea   : > { %v1660_v4 = vpack.c.bf16 %v1598_v2, %v1597_v0 }
 0x3eb   : > { %v1585_v6 = vrot.slane %v1584_v3, 4 }
 0x3ed   : > { %v1586_v7 = vadd.f32 %v1585_v6, %v1584_v3 }
 0x3ef   : > { %v1587_v8 = vrot.slane %v1586_v7, 2 }
 0x3f1   : > { %v1588_v9 = vadd.f32 %v1587_v8, %v1586_v7 }
 0x3f3   : > { %v1589_v10 = vrot.slane %v1588_v9, 1 }
 0x3f5   : > { %v1590_v11 = vadd.f32 %v1589_v10, %v1588_v9 }
 0x3f7   : > { %v1592_v13 = vmul.f32 0.0625, %v1590_v11 }
 0x3f9   : > { %v1594_v14 = vadd.f32 %v1593_v12, %v1592_v13 }
 0x3fb   : > { %v1599_v15 = vpack.c.bf16 %v1594_v14, %v1594_v14 }
 0x3fd   : > { %2526 = vmatmul.mubr.msk.bf16.vlgmr.msra.gmra.mrb[40].mxu1 %vm1581_vm5, %v1599_v15 }
 0x3fe   : > { %2530 = vmatpush3.bf16.msra.mxu1 %v2659_v48  ;;  %2533 = vmatprep.mubr.msk.bf16.mxu1 %vm2736_vm1, %v2735_v5 }
 0x3ff   : > { %2531 = vmatprep.subr.bf16.mxu1 %v2735_v5 }
 0x402   : > { %2532 = vmatpush3.bf16.msra.mxu1 %v2660_v49 }
 0x403   : > { %2584 = vmatprep.subr.bf16.mxu1 %v2578_v20 }
 0x405   : > { %2534 = vmatmul.mubr.msk.bf16.vlgmr.msra.gmra.mrb[44].mxu1 %vm1581_vm5, %v1660_v4 }
 0x406   : > { %2586 = vmatpush3.bf16.msra.mxu1 %v2578_v20 }
 0x407   : > { %2588 = vmatprep.subr.bf16.mxu1 %v2581_v22 }
 0x40a   : > { %2590 = vmatpush3.bf16.msra.mxu1 %v2581_v22 }
 0x40b   : > { %2569 = vmatprep.subr.bf16.mxu1 %v2735_v5 }
 0x4d0   : > { %v1654_v26 = vpop.f32.mrb[40].mxu1 }
 0x4d1   : > { %v1655_v27 = vadd.f32 %v1654_v26, %v1604_v24  ;;  %v2527_v28 = vpop.f32.mrb[41].mxu1  ;;  %v2661_v24 = vld [vmem:[%s3225_s17] sm:$0xff]  }
 0x4d2   : > { %v1657_v29 = vpop.f32.mrb[42].mxu1 }
 0x4d3   : > { %1718 = vrot.lane.b32.xlu1 %v1655_v27, %s2738_s24  ;;  %v2528_v30 = vpop.f32.mrb[43].mxu1  ;;  %v1711_v39 = vmul.f32 0.35355338, %v1655_v27 }
 0x4d5   : > { %v1798_v42 = vrot.slane %v1711_v39, %v3122_v31 }
 0x4d8   : > { %v1704_v33 = vpop.f32.mrb[44].mxu1 }
 0x4d9   : > { %v1705_v34 = vadd.f32 %v1704_v33, %v1665_v32  ;;  %v2535_v35 = vpop.f32.mrb[45].mxu1 }
 0x4da   : > { %v1707_v36 = vpop.f32.mrb[46].mxu1 }
 0x4db   : > { %2093 = vrot.lane.b32.xlu1 %v1705_v34, %s2739_s20  ;;  %1801 = vrot.lane.b32.xlu0 %v1705_v34, %s2738_s24  ;;  %v2536_v37 = vpop.f32.mrb[47].mxu1  ;;  %v1708_v38 = vadd.f32 %v1707_v36, %v1665_v32 }
 0x4df   : > { %2008 = vrot.lane.b32.xlu1 %v1655_v27, %s2739_s20  ;;  %1803 = vrot.lane.b32.xlu0 %v1708_v38, %s2738_s24  ;;  %s593_s24 = sand.u32 1, %s2725_s30  }
 0x4e0   : > { %s594_s27 = scalar_lea.vmem [#allocation2], %s593_s24 }
 0x4e1   : > { %s2186_s28 = sshll.u32 %s594_s27, 4  ;;  %s3168_s28 = int_to_ptr.vmem [resolvable:$true] %s2186_s28 }
 0x4e2   : > { %s2671_s1 = scalar_lea.vmem %s3168_s28, 16  ;;  %p2678_p0 = scmp.lt.s32.totalorder %s3168_s28, %s2676_s5 }
 0x4e3   : > { %2095 = vrot.lane.b32.xlu0 %v1708_v38, %s2739_s20  ;;  %s2174_s20 = scalar_lea.sflag [#allocation3], %s593_s24  ;;  %p2672_p11 = scmp.ne.s32.totalorder %s3168_s28, %s2671_s1 }
 0x4e4   : > { %p2679_p1 = scmp.lt.s32.totalorder %s2677_s29, %s2671_s1 }
 0x4e5   : > { %p2673_p12 = pnand %p2672_p11, %p2879_p5 }
 0x4e6   : > { %p2680_p2 = por %p2679_p1, %p2678_p0 }
 0x4e7   : > { %p2674_p13 = pneg %p2673_p12 }
 0x4e9   : > { %p2681_p3 = pnand %p2680_p2, %p2674_p13 }
 0x545   : > { %v1719_v40 = vpop.permute.xlu1 %1718 }
 0x546   : > { %v1721_v41 = vmul.f32 %v1719_v40, %v1711_v39 }
 0x548   : > { %2546 = vmatmul.mubr.msk.f32.vlgmr.msra.gmra.mrb[48].mxu0 %vm1581_vm5, %v1721_v41 }
 0x549   : > { %2561 = vmatprep.mubr.msk.f32.mxu0 %vm2736_vm1, %v2735_v5  ;;  %2560 = vmatpush3.msk.msra.mxu0 %vm939_vm2, %v1716_v47 }
 0x54a   : > { %2564 = vmatprep.subr.msk.mxu0 %vm939_vm2, %v1716_v47 }
 0x54d   : > { %v1802_v43 = vpop.permute.xlu0 %1801  ;;  %v2094_v30 = vpop.permute.xlu1 %2093 }
 0x54e   : > { %v1807_v44 = vmul.f32 %v1802_v43, %v1798_v42 }
 0x550   : > { %2556 = vmatprep.mubr.msk.f32.mxu1 %vm1581_vm5, %v1807_v44 }
 0x551   : > { %v1804_v45 = vpop.permute.xlu0 %1803  ;;  %v2009_v41 = vpop.permute.xlu1 %2008 }
 0x552   : > { %v1808_v46 = vmul.f32 %v1804_v45, %v1798_v42 }
 0x554   : > { %2557 = vmatmul.mubr.msk.f32.vlgmr.msra.gmra.mrb[48].mxu1 %vm1581_vm5, %v1808_v46  ;;  %v2116_v46 = vld [vmem:[%s3226_s18] sm:$0x1] }
 0x555   : > { %2573 = vmatprep.mubr.msk.bf16.mxu1 %vm2736_vm1, %v2735_v5  ;;  %2570 = vmatpush3.bf16.msra.mxu1 %v2661_v24  ;;  %v2096_v28 = vpop.permute.xlu0 %2095 }
 0x556   : > { %2571 = vmatprep.subr.bf16.mxu1 %v2735_v5 }
 0x559   : > { %2572 = vmatpush3.bf16.msra.mxu1 %v2662_v25 }
 0x61b   : > { %v1791_v48 = vpop.f32.mrb[48].mxu0 }
 0x61c   : > { %v2547_v49 = vpop.f32.mrb[49].mxu0 }
 0x627   : > { %v2558_v50 = vpop.f32.mrb[48].mxu1 }
 0x628   : > { %v1892_v51 = vsel %vm1890_vm6, %v2558_v50, -inf  ;;  %v1881_v52 = vpop.f32.mrb[49].mxu1 }
 0x629   : > { %v1891_v53 = vsel %vm1890_vm6, %v1881_v52, -inf }
 0x62a   : > { %v1893_v54 = vmax.f32 %v1891_v53, %v1892_v51 }
 0x62c   : > { %v1894_v55 = vrot.slane %v1893_v54, 4 }
 0x62e   : > { %v1895_v56 = vmax.f32 %v1893_v54, %v1894_v55 }
 0x630   : > { %v1896_v57 = vrot.slane %v1895_v56, 2 }
 0x632   : > { %v1897_v58 = vmax.f32 %v1895_v56, %v1896_v57 }
 0x634   : > { %v1898_v59 = vrot.slane %v1897_v58, 1 }
 0x636   : > { %v1899_v60 = vmax.f32 %v1897_v58, %v1898_v59 }
 0x638   : > { %v1900_v61 = vmax.f32 %v1791_v48, %v1899_v60 }
 0x63a   : > { %v1901_v62 = vsub.f32 %v1791_v48, %v1900_v61  ;;  %v1907_v63 = vrot.slane %v1900_v61, %v3122_v31 }
 0x63c   : > { %v1908_v0 = vsub.f32 %v1881_v52, %v1907_v63  ;;  %v1909_v1 = vsub.f32 %v2558_v50, %v1907_v63  ;;  %v1902_v8 = vmul.f32 1.442695, %v1901_v62 }
 0x63e   : > { %v1910_v2 = vmul.f32 1.442695, %v1908_v0  ;;  %v1912_v3 = vmul.f32 1.442695, %v1909_v1 }
 0x640   : > { %2663 = vpow2.f32 %v1910_v2 }
 0x641   : > { %2665 = vpow2.f32 %v1912_v3 }
 0x642   : > { %2667 = vpow2.f32 %v1902_v8 }
 0x64a   : > { %v2664_v4 = vpop.eup %2663 }
 0x64b   : > { %v2666_v6 = vpop.eup %2665  ;;  %v1914_v7 = vsel %vm1890_vm6, %v2664_v4, 0.0 }
 0x64c   : > { %v1915_v9 = vsel %vm1890_vm6, %v2666_v6, 0.0  ;;  %v2668_v17 = vpop.eup %2667 }
 0x64d   : > { %v1916_v10 = vadd.f32 %v1915_v9, %v1914_v7 }
 0x64f   : > { %v1917_v11 = vrot.slane %v1916_v10, 4 }
 0x651   : > { %v1918_v12 = vadd.f32 %v1917_v11, %v1916_v10 }
 0x653   : > { %v1919_v13 = vrot.slane %v1918_v12, 2 }
 0x655   : > { %v1920_v14 = vadd.f32 %v1919_v13, %v1918_v12 }
 0x657   : > { %v1921_v15 = vrot.slane %v1920_v14, 1 }
 0x659   : > { %v1922_v16 = vadd.f32 %v1921_v15, %v1920_v14 }
 0x65b   : > { %v1923_v18 = vadd.f32 %v2668_v17, %v1922_v16 }
 0x65d   : > { %2669 = vrcp.f32 %v1923_v18 }
 0x667   : > { %v2670_v19 = vpop.eup %2669 }
 0x668   : > { %v1925_v20 = vmul.f32 %v2670_v19, %v2668_v17  ;;  %v1929_v21 = vrot.slane %v2670_v19, %v3122_v31 }
 0x66a   : > { %2562 = vmatmul.mubr.msk.f32.vlgmr.msra.gmra.mrb[50].mxu0 %vm1890_vm6, %v1925_v20  ;;  %v1930_v22 = vmul.f32 %v2664_v4, %v1929_v21  ;;  %v1931_v23 = vmul.f32 %v2666_v6, %v1929_v21 }
 0x66b   : > { %2565 = vmatpush3.msk.msra.mxu0 %vm939_vm2, %v1716_v47 }
 0x66c   : > { %2566 = vmatprep.mubr.msk.f32.mxu0 %vm1890_vm6, %v1930_v22 }
 0x66e   : > { %2567 = vmatmul.mubr.msk.f32.vlgmr.msra.gmra.mrb[52].mxu0 %vm1890_vm6, %v1931_v23 }
 0x73d   : > { %v2004_v26 = vpop.f32.mrb[50].mxu0 }
 0x73e   : > { %v2563_v27 = vpop.f32.mrb[51].mxu0  ;;  %v2011_v42 = vmul.f32 %v2009_v41, %v2004_v26 }
 0x741   : > { %v2568_v29 = vpop.f32.mrb[52].mxu0 }
 0x742   : > { %v2100_v31 = vmul.f32 %v2568_v29, %v2096_v28  ;;  %v2084_v32 = vpop.f32.mrb[53].mxu0 }
 0x743   : > { %v2099_v33 = vmul.f32 %v2094_v30, %v2084_v32 }
 0x744   : > { %v2102_v34 = vsel %vm1581_vm5, %v2100_v31, 0.0 }
 0x745   : > { %v2101_v35 = vsel %vm1581_vm5, %v2099_v33, 0.0 }
 0x746   : > { %v2103_v5 = vadd.f32 %v2102_v34, %v2101_v35 }
 0x748   : > { %v2104_v36 = vrot.slane %v2103_v5, 4 }
 0x74a   : > { %v2105_v37 = vadd.f32 %v2104_v36, %v2103_v5 }
 0x74c   : > { %v2106_v38 = vrot.slane %v2105_v37, 2 }
 0x74e   : > { %v2107_v39 = vadd.f32 %v2106_v38, %v2105_v37 }
 0x750   : > { %v2108_v40 = vrot.slane %v2107_v39, 1 }
 0x752   : > { %v2109_v43 = vadd.f32 %v2108_v40, %v2107_v39 }
 0x754   : > { %v2110_v44 = vadd.f32 %v2109_v43, %v2011_v42 }
 0x756   : > { %v2111_v45 = vpack.c.bf16 %v2110_v44, %v2110_v44 }
 0x758   : > { %2574 = vmatmul.mubr.msk.bf16.vlgmr.msra.gmra.mrb[52].mxu1 %vm1581_vm5, %v2111_v45 }
 0x82b   : > { %v2166_v47 = vpop.f32.mrb[52].mxu1 }
 0x82c   : > { %v2167_v48 = vadd.f32 %v2166_v47, %v2116_v46  ;;  %v2575_v49 = vpop.f32.mrb[53].mxu1 }
 0x82d   : > { %v2169_v50 = vpop.f32.mrb[54].mxu1 }
 0x82e   : > { %2172 = vst [vmem:[%s594_s27] sm:$0x1] %v2167_v48  ;;  %v2576_v51 = vpop.f32.mrb[55].mxu1 }
 0x82f   : > { %2684 = shalt.err (!%p2681_p3)
}
 0x830   : > { %s2685_s24 = scalar_lea.hbm %s3166_s4, 16  ;;  %s2689_s23 = scalar_lea.hbm %s3227_s19, 32 }
 0x831   : > { %p2686_p4 = scmp.ne.s32.totalorder %s3166_s4, %s2685_s24  ;;  %p2690_p9 = scmp.lt.u32.totalorder %s3166_s4, %s3227_s19 }
 0x832   : > { %p2691_p10 = scmp.lt.u32.totalorder %s2689_s23, %s2685_s24  ;;  %p2693_p12 = scmp.lt.u32.totalorder %s2685_s24, %s3166_s4 }
 0x833   : > { %p2687_p7 = pnand %p2686_p4, %p2879_p5 }
 0x834   : > { %p2692_p11 = por %p2691_p10, %p2690_p9 }
 0x835   : > { %p2688_p8 = pneg %p2687_p7 }
 0x836   : > { %p2694_p13 = por %p2693_p12, %p2692_p11 }
 0x838   : > { %p2695_p0 = pnand %p2694_p13, %p2688_p8 }
 0x83a   : > { %2698 = shalt.err (!%p2695_p0)
}
 0x83b   : > { %2599 = dma.vmem_to_hbm [thread:$0]  (%p2879_p5), %s3168_s28, 16, %s3166_s4, %s2174_s20  }
 0x83c PF: > { %p2605_p1 = scmp.ge.s32.totalorder %s2733_s21, 2  ;;  %s2198_s1 = sand.u32 1, %s2721_s0  }
 0x83d   : > { %s2199_s29 = scalar_lea.sflag [#allocation3], %s2198_s1 }
 0x83e   : > { %p2602_p2 = pnand %p2605_p1, %p2883_p6 }
 0x840   : > { %2716 = dma.done.wait (!%p2602_p2), %s2199_s29, 16  }
 0x841   : > { %2718 = vsyncadd (!%p2602_p2), %s2199_s29, 4294967280  ;;  %s3249_s21 = sld [smem:[#allocation6_spill]]  ;;  %s3250_s24 = sld [smem:[#allocation5_spill]] }
 0x842   : > { %s3251_s20 = sld [smem:[#allocation7_spill]]  ;;  %s3252_s0 = smov %s2725_s30 }
 0x847   : > { %p29_p3 = scmp.ge.s32.totalorder %s3249_s21, 4   ;;  %s3253_s30 = smov %s3250_s24 }
 0x849   :  { %31 = sbr.rel (!%p29_p3) target bundleno = 10 (0xa), region = 139 }
 0x850   :  { %2203 = vsyncpa [#allocation3], 1 }
 0x851   :  { %2205 = vsyncpa [#allocation3 + $0x1], 1 }

</bundles_post_ra>
